<compile_context>
chip_gen: v7x
topology: tpu7x:2x2x1
jax: 0.10.0
libtpu: 0.0.40
codegen_flags: <defaults>
</compile_context>

<pallas_src>
import functools

import jax
import jax.numpy as jnp
import numpy as np
from jax import lax
from jax.experimental import pallas as pl
from jax.experimental.pallas import tpu as pltpu


def _symmetry_loss_kernel(scal_ref,                       # (2,) SMEM prefetch
                          prm_ref, pts_ref, grid_ref,     # VMEM inputs
                          planes_ref, planesT_ref, bmask_ref,
                          out_ref,                        # (1,128) VMEM output
                          sd_acc,                         # (1,1) VMEM scratch
                          *, B, P, M, N, TN, R, Rp, w_r):
    f32 = jnp.float32
    L = M * TN                                            # flat lane width
    t = pl.program_id(0)
    nt = pl.num_programs(0)

    gmin = scal_ref[0]            # grid_min
    inv_rng = scal_ref[1]         # 1 / (grid_max - grid_min)

    # ---- flat (plane-major) layout: lane l = m*TN + n ----------------------
    pts = pts_ref[...]                                    # (3, TN) points tile
    pts_flat = jnp.concatenate([pts] * M, axis=1)         # (3, L) tiled per plane
    px = pts_flat[0:1, :]
    py = pts_flat[1:2, :]
    pz = pts_flat[2:3, :]

    prm = prm_ref[...]                                    # (4, L) params per lane
    nx = prm[0:1, :]
    ny = prm[1:2, :]
    nz = prm[2:3, :]
    dd = prm[3:4, :]

    # ---- reflections for all planes/points at once (VPU) -------------------
    proj2 = 2.0 * (nx * px + ny * py + nz * pz + dd)      # (1, L)
    rx = px - proj2 * nx
    ry = py - proj2 * ny
    rz = pz - proj2 * nz

    rmax = f32(R - 1)

    def to_idx(c):
        nrm = (c - gmin) * inv_rng                        # matches reference order
        return jnp.clip(jnp.round(nrm * rmax), 0.0, rmax).astype(jnp.int32)

    ix, iy, iz = to_idx(rx), to_idx(ry), to_idx(rz)       # (1, L) int32
    rxy = ix * R + iy                                     # flat (x, y) index

    # ---- single batched one-hot gather over all planes ---------------------
    iota_xy = lax.broadcasted_iota(jnp.int32, (R * R, L), 0)
    oh_xy = (iota_xy == rxy).astype(f32)                  # (R^2, L)
    # grid_ref: (3*Rp, R^2), rows c*Rp + z, padded rows are zero.
    slab = jnp.dot(grid_ref[...], oh_xy,
                   preferred_element_type=f32)            # (3*Rp, L) — one MXU call

    iota_z = lax.broadcasted_iota(jnp.int32, (Rp, L), 0)
    oh_z = (iota_z == iz).astype(f32)                     # (Rp, L)
    cx = jnp.sum(slab[0 * Rp:1 * Rp, :] * oh_z, axis=0, keepdims=True)
    cy = jnp.sum(slab[1 * Rp:2 * Rp, :] * oh_z, axis=0, keepdims=True)
    cz = jnp.sum(slab[2 * Rp:3 * Rp, :] * oh_z, axis=0, keepdims=True)

    dx = rx - cx
    dy = ry - cy
    dz = rz - cz
    dist = jnp.sqrt(dx * dx + dy * dy + dz * dz)          # (1, L)
    part = jnp.sum(dist, axis=1, keepdims=True)           # (1, 1)

    @pl.when(t == 0)
    def _():
        sd_acc[...] = jnp.zeros_like(sd_acc)

    sd_acc[...] += part

    # ---- finalize on the last points tile -----------------------------------
    @pl.when(t == nt - 1)
    def _():
        avg_sd = sd_acc[...] * f32(1.0 / N) * f32(1.0 / B)      # (1, 1)

        # Regularization: vectorized Gram, pure VPU broadcasts (no MXU).
        planes = planes_ref[...]                                 # (M, 4)
        normals = planes[:, 0:3]                                 # (M, 3)
        ss = jnp.sum(normals * normals, axis=1, keepdims=True)   # (M, 1)
        nhat = normals * (1.0 / jnp.maximum(jnp.sqrt(ss), 1e-12))

        planesT = planesT_ref[...]                               # (4, M)
        normalsT = planesT[0:3, :]                               # (3, M)
        ssT = jnp.sum(normalsT * normalsT, axis=0, keepdims=True)
        nhatT = normalsT * (1.0 / jnp.maximum(jnp.sqrt(ssT), 1e-12))

        G = (nhat[:, 0:1] * nhatT[0:1, :]
             + nhat[:, 1:2] * nhatT[1:2, :]
             + nhat[:, 2:3] * nhatT[2:3, :])                     # (M, M)

        # sum_b ||G_b - I||_F^2 = sum(bmask * G^2) - 2*tr(G) + M
        gg = bmask_ref[...] * G * G
        gg_sum = jnp.sum(jnp.sum(gg, axis=1, keepdims=True),
                         axis=0, keepdims=True)                  # (1, 1)
        tr = jnp.sum(jnp.sum(nhat * nhat, axis=1, keepdims=True),
                     axis=0, keepdims=True)                      # (1, 1)
        r_sum = gg_sum - 2.0 * tr + f32(M)
        avg_r = r_sum * f32(1.0 / B)

        total = avg_sd + f32(w_r) * avg_r

        # Single lane-padded (1, 128) store: lanes 0,1,2 = total, sd, r.
        lane = lax.broadcasted_iota(jnp.int32, (1, 128), 1)
        out_ref[...] = (jnp.where(lane == 0, total, 0.0)
                        + jnp.where(lane == 1, avg_sd, 0.0)
                        + jnp.where(lane == 2, avg_r, 0.0)).astype(f32)


def _pick_tile(n):
    # Largest multiple-of-128 divisor of N up to 1024 (bounds VMEM on v7x).
    for t in (1024, 512, 256, 128):
        if n % t == 0:
            return t
    return n  # fallback: full extent (block == array dim is always legal)


def symmetry_loss(pred_params, surface_points, closest_point_grid,
                  grid_min, grid_max, w_r):
    pred_params = pred_params.astype(jnp.float32)
    surface_points = surface_points.astype(jnp.float32)
    closest_point_grid = closest_point_grid.astype(jnp.float32)

    B, P, _ = pred_params.shape
    N = surface_points.shape[0]
    R = closest_point_grid.shape[0]
    M = B * P
    Rp = ((R + 7) // 8) * 8

    TN = _pick_tile(N)
    assert N % TN == 0
    nt = N // TN
    L = M * TN

    planes2d = pred_params.reshape(M, 4)                  # (M, 4)
    planesT = planes2d.T                                  # (4, M)
    pts_t = surface_points.T                              # (3, N) coord-major

    # Plane params broadcast per flat lane: prm_flat[c, m*TN + n] = planes2d[m, c]
    prm_flat = jnp.repeat(planesT, TN, axis=1)            # (4, M*TN), resident

    # Grid slab: slab[c*Rp + z, x*R + y] = grid[x, y, z, c]; padded rows zero.
    g = jnp.transpose(closest_point_grid, (3, 2, 0, 1)).reshape(3, R, R * R)
    grid_slab = jnp.zeros((3, Rp, R * R), jnp.float32).at[:, :R, :].set(g)
    grid_slab = grid_slab.reshape(3 * Rp, R * R)

    # Per-batch block mask for the Gram regularizer.
    pid = jnp.arange(M) // P
    bmask = (pid[:, None] == pid[None, :]).astype(jnp.float32)   # (M, M)

    gmin = jnp.asarray(grid_min, jnp.float32).reshape(())
    gmax = jnp.asarray(grid_max, jnp.float32).reshape(())
    scal = jnp.stack([gmin, 1.0 / (gmax - gmin)]).astype(jnp.float32)  # (2,)

    kernel = functools.partial(_symmetry_loss_kernel,
                               B=B, P=P, M=M, N=N, TN=TN, R=R, Rp=Rp,
                               w_r=float(w_r))

    out = pl.pallas_call(
        kernel,
        out_shape=jax.ShapeDtypeStruct((1, 128), jnp.float32),
        grid_spec=pltpu.PrefetchScalarGridSpec(
            num_scalar_prefetch=1,            # [gmin, 1/(gmax-gmin)] -> SMEM
            grid=(nt,),                       # reduction over points tiles
            in_specs=[
                pl.BlockSpec((4, L), lambda t, s: (0, 0)),            # prm_flat (resident)
                pl.BlockSpec((3, TN), lambda t, s: (0, t)),           # points tile
                pl.BlockSpec((3 * Rp, R * R), lambda t, s: (0, 0)),   # grid slab (resident)
                pl.BlockSpec((M, 4), lambda t, s: (0, 0)),            # planes
                pl.BlockSpec((4, M), lambda t, s: (0, 0)),            # planes^T
                pl.BlockSpec((M, M), lambda t, s: (0, 0)),            # batch block mask
            ],
            out_specs=pl.BlockSpec((1, 128), lambda t, s: (0, 0)),
            scratch_shapes=[pltpu.VMEM((1, 1), jnp.float32)],         # sd accumulator
        ),
        compiler_params=pltpu.CompilerParams(
            dimension_semantics=("arbitrary",)),
    )(scal, prm_flat, pts_t, grid_slab, planes2d, planesT, bmask)

    return out[0, 0], out[0, 1], out[0, 2]


def _reference(pred_params, points, grid, grid_min, grid_max, w_r):
    """Pure-JAX transcription of the PyTorch module for validation."""
    B, P, _ = pred_params.shape
    R = grid.shape[0]
    total_sd, total_r = 0.0, 0.0
    for i in range(B):
        planes = pred_params[i]
        sd = 0.0
        for p in range(P):
            n, d = planes[p, :3], planes[p, 3]
            proj = jnp.sum(points * n, axis=1) + d
            refl = points - 2.0 * proj[:, None] * n[None, :]
            nrm = (refl - grid_min) / (grid_max - grid_min)
            idx = jnp.clip(jnp.round(nrm * (R - 1)), 0, R - 1).astype(jnp.int32)
            closest = grid[idx[:, 0], idx[:, 1], idx[:, 2]]
            sd += jnp.mean(jnp.linalg.norm(refl - closest, axis=1))
        normals = planes[:, :3]
        denom = jnp.maximum(
            jnp.linalg.norm(normals, axis=1, keepdims=True), 1e-12)
        nhat = normals / denom
        A = nhat @ nhat.T - jnp.eye(3, dtype=jnp.float32)
        total_sd += sd
        total_r += jnp.sum(A ** 2)
    avg_sd = total_sd / B
    avg_r = total_r / B
    return avg_sd + w_r * avg_r, avg_sd, avg_r


if __name__ == "__main__":
    key = jax.random.PRNGKey(0)
    k1, k2, k3 = jax.random.split(key, 3)

    B, P, N, R = 2, 3, 128, 8
    pred_params = jax.random.normal(k1, (B, P, 4), jnp.float32)
    surface_points = jax.random.uniform(k2, (N, 3), jnp.float32, -1.0, 1.0)
    closest_point_grid = jax.random.uniform(k3, (R, R, R, 3),
                                            jnp.float32, -1.0, 1.0)
    grid_min, grid_max = -1.0, 1.0
    w_r = 0.25  # deterministic hyperparameter from __init__

    total, avg_sd, avg_r = symmetry_loss(pred_params, surface_points,
                                         closest_point_grid,
                                         grid_min, grid_max, w_r)
    jax.block_until_ready((total, avg_sd, avg_r))

    t_ref, sd_ref, r_ref = _reference(pred_params, surface_points,
                                      closest_point_grid,
                                      grid_min, grid_max, w_r)
    np.testing.assert_allclose(
        np.array([total, avg_sd, avg_r], dtype=np.float32),
        np.array([t_ref, sd_ref, r_ref], dtype=np.float32),
        rtol=1e-4, atol=1e-4)

    print("KERNEL_OK")
</pallas_src>

<mosaic_0001>
module attributes {stable_mosaic.version = 11 : i64} {
  func.func @_symmetry_loss_kernel(%arg0: i32, %arg1: memref<2xf32, #tpu.memory_space<smem>>, %arg2: memref<4x768xf32, #tpu.memory_space<vmem>>, %arg3: memref<3x128xf32, #tpu.memory_space<vmem>>, %arg4: memref<24x64xf32, #tpu.memory_space<vmem>>, %arg5: memref<6x4xf32, #tpu.memory_space<vmem>>, %arg6: memref<4x6xf32, #tpu.memory_space<vmem>>, %arg7: memref<6x6xf32, #tpu.memory_space<vmem>>, %arg8: memref<1x128xf32, #tpu.memory_space<vmem>>, %arg9: memref<1x1xf32, #tpu.memory_space<vmem>>) attributes {dimension_semantics = [#tpu.dimension_semantics<arbitrary>], iteration_bounds = array<i64: 1>, scalar_prefetch = 1 : i64, scratch_operands = 1 : i64, tpu.core_type = #tpu.core_type<tc>, window_params = [{pipeline_mode = #tpu.pipeline_mode<synchronous>, transform_indices = @transform_0, window_bounds = array<i64: 4, 768>}, {transform_indices = @transform_1, window_bounds = array<i64: 3, 128>}, {pipeline_mode = #tpu.pipeline_mode<synchronous>, transform_indices = @transform_2, window_bounds = array<i64: 24, 64>}, {pipeline_mode = #tpu.pipeline_mode<synchronous>, transform_indices = @transform_3, window_bounds = array<i64: 6, 4>}, {pipeline_mode = #tpu.pipeline_mode<synchronous>, transform_indices = @transform_4, window_bounds = array<i64: 4, 6>}, {pipeline_mode = #tpu.pipeline_mode<synchronous>, transform_indices = @transform_5, window_bounds = array<i64: 6, 6>}, {pipeline_mode = #tpu.pipeline_mode<synchronous>, transform_indices = @transform_6, window_bounds = array<i64: 1, 128>}]} {
    %c0 = arith.constant 0 : index
    %0 = memref.load %arg1[%c0] : memref<2xf32, #tpu.memory_space<smem>>
    %c1 = arith.constant 1 : index
    %1 = memref.load %arg1[%c1] : memref<2xf32, #tpu.memory_space<smem>>
    %c0_0 = arith.constant 0 : index
    %c0_1 = arith.constant 0 : index
    %2 = vector.load %arg3[%c0_0, %c0_1] : memref<3x128xf32, #tpu.memory_space<vmem>>, vector<3x128xf32>
    %3 = tpu.concatenate %2, %2, %2, %2, %2, %2 in 1 : vector<3x128xf32>, vector<3x128xf32>, vector<3x128xf32>, vector<3x128xf32>, vector<3x128xf32>, vector<3x128xf32> -> vector<3x768xf32>
    %4 = vector.extract_strided_slice %3 {offsets = [0, 0], sizes = [1, 768], strides = [1, 1]} : vector<3x768xf32> to vector<1x768xf32>
    %5 = vector.extract_strided_slice %3 {offsets = [1, 0], sizes = [1, 768], strides = [1, 1]} : vector<3x768xf32> to vector<1x768xf32>
    %6 = vector.extract_strided_slice %3 {offsets = [2, 0], sizes = [1, 768], strides = [1, 1]} : vector<3x768xf32> to vector<1x768xf32>
    %c0_2 = arith.constant 0 : index
    %c0_3 = arith.constant 0 : index
    %7 = vector.load %arg2[%c0_2, %c0_3] : memref<4x768xf32, #tpu.memory_space<vmem>>, vector<4x768xf32>
    %8 = vector.extract_strided_slice %7 {offsets = [0, 0], sizes = [1, 768], strides = [1, 1]} : vector<4x768xf32> to vector<1x768xf32>
    %9 = vector.extract_strided_slice %7 {offsets = [1, 0], sizes = [1, 768], strides = [1, 1]} : vector<4x768xf32> to vector<1x768xf32>
    %10 = vector.extract_strided_slice %7 {offsets = [2, 0], sizes = [1, 768], strides = [1, 1]} : vector<4x768xf32> to vector<1x768xf32>
    %11 = vector.extract_strided_slice %7 {offsets = [3, 0], sizes = [1, 768], strides = [1, 1]} : vector<4x768xf32> to vector<1x768xf32>
    %12 = arith.mulf %8, %4 : vector<1x768xf32>
    %13 = arith.mulf %9, %5 : vector<1x768xf32>
    %14 = arith.addf %12, %13 : vector<1x768xf32>
    %15 = arith.mulf %10, %6 : vector<1x768xf32>
    %16 = arith.addf %14, %15 : vector<1x768xf32>
    %17 = arith.addf %16, %11 : vector<1x768xf32>
    %cst = arith.constant 2.000000e+00 : f32
    %18 = vector.broadcast %cst : f32 to vector<1x768xf32>
    %19 = arith.mulf %18, %17 : vector<1x768xf32>
    %20 = arith.mulf %19, %8 : vector<1x768xf32>
    %21 = arith.subf %4, %20 : vector<1x768xf32>
    %22 = arith.mulf %19, %9 : vector<1x768xf32>
    %23 = arith.subf %5, %22 : vector<1x768xf32>
    %24 = arith.mulf %19, %10 : vector<1x768xf32>
    %25 = arith.subf %6, %24 : vector<1x768xf32>
    %26 = vector.broadcast %0 : f32 to vector<1x768xf32>
    %27 = arith.subf %21, %26 : vector<1x768xf32>
    %28 = vector.broadcast %1 : f32 to vector<1x768xf32>
    %29 = arith.mulf %27, %28 : vector<1x768xf32>
    %cst_4 = arith.constant 7.000000e+00 : f32
    %30 = vector.broadcast %cst_4 : f32 to vector<1x768xf32>
    %31 = arith.mulf %29, %30 : vector<1x768xf32>
    %32 = math.roundeven %31 : vector<1x768xf32>
    %cst_5 = arith.constant 0.000000e+00 : f32
    %cst_6 = arith.constant 7.000000e+00 : f32
    %33 = vector.broadcast %cst_5 : f32 to vector<1x768xf32>
    %34 = arith.maximumf %33, %32 : vector<1x768xf32>
    %35 = vector.broadcast %cst_6 : f32 to vector<1x768xf32>
    %36 = arith.minimumf %35, %34 : vector<1x768xf32>
    %37 = arith.fptosi %36 : vector<1x768xf32> to vector<1x768xi32>
    %38 = vector.broadcast %0 : f32 to vector<1x768xf32>
    %39 = arith.subf %23, %38 : vector<1x768xf32>
    %40 = vector.broadcast %1 : f32 to vector<1x768xf32>
    %41 = arith.mulf %39, %40 : vector<1x768xf32>
    %cst_7 = arith.constant 7.000000e+00 : f32
    %42 = vector.broadcast %cst_7 : f32 to vector<1x768xf32>
    %43 = arith.mulf %41, %42 : vector<1x768xf32>
    %44 = math.roundeven %43 : vector<1x768xf32>
    %cst_8 = arith.constant 0.000000e+00 : f32
    %cst_9 = arith.constant 7.000000e+00 : f32
    %45 = vector.broadcast %cst_8 : f32 to vector<1x768xf32>
    %46 = arith.maximumf %45, %44 : vector<1x768xf32>
    %47 = vector.broadcast %cst_9 : f32 to vector<1x768xf32>
    %48 = arith.minimumf %47, %46 : vector<1x768xf32>
    %49 = arith.fptosi %48 : vector<1x768xf32> to vector<1x768xi32>
    %50 = vector.broadcast %0 : f32 to vector<1x768xf32>
    %51 = arith.subf %25, %50 : vector<1x768xf32>
    %52 = vector.broadcast %1 : f32 to vector<1x768xf32>
    %53 = arith.mulf %51, %52 : vector<1x768xf32>
    %cst_10 = arith.constant 7.000000e+00 : f32
    %54 = vector.broadcast %cst_10 : f32 to vector<1x768xf32>
    %55 = arith.mulf %53, %54 : vector<1x768xf32>
    %56 = math.roundeven %55 : vector<1x768xf32>
    %cst_11 = arith.constant 0.000000e+00 : f32
    %cst_12 = arith.constant 7.000000e+00 : f32
    %57 = vector.broadcast %cst_11 : f32 to vector<1x768xf32>
    %58 = arith.maximumf %57, %56 : vector<1x768xf32>
    %59 = vector.broadcast %cst_12 : f32 to vector<1x768xf32>
    %60 = arith.minimumf %59, %58 : vector<1x768xf32>
    %61 = arith.fptosi %60 : vector<1x768xf32> to vector<1x768xi32>
    %c8_i32 = arith.constant 8 : i32
    %62 = vector.broadcast %c8_i32 : i32 to vector<1x768xi32>
    %63 = arith.muli %37, %62 : vector<1x768xi32>
    %64 = arith.addi %63, %49 : vector<1x768xi32>
    %65 = tpu.iota {dimensions = array<i32: 0>} : vector<64x768xi32>
    %66 = vector.broadcast %64 : vector<1x768xi32> to vector<64x768xi32>
    %67 = arith.cmpi eq, %65, %66 : vector<64x768xi32>
    %68 = arith.extui %67 : vector<64x768xi1> to vector<64x768xi32>
    %69 = arith.sitofp %68 : vector<64x768xi32> to vector<64x768xf32>
    %c0_13 = arith.constant 0 : index
    %c0_14 = arith.constant 0 : index
    %70 = vector.load %arg4[%c0_13, %c0_14] : memref<24x64xf32, #tpu.memory_space<vmem>>, vector<24x64xf32>
    %cst_15 = arith.constant dense<0.000000e+00> : vector<24x768xf32>
    %71 = tpu.matmul %70, %69, %cst_15 {dimension_numbers = #tpu.dot_dimension_numbers<[1], [0], [0], [1], [0, 0, 1, 1], [], []>} : vector<24x64xf32>, vector<64x768xf32>, vector<24x768xf32> -> vector<24x768xf32>
    %72 = tpu.iota {dimensions = array<i32: 0>} : vector<8x768xi32>
    %73 = vector.broadcast %61 : vector<1x768xi32> to vector<8x768xi32>
    %74 = arith.cmpi eq, %72, %73 : vector<8x768xi32>
    %75 = arith.extui %74 : vector<8x768xi1> to vector<8x768xi32>
    %76 = arith.sitofp %75 : vector<8x768xi32> to vector<8x768xf32>
    %77 = vector.extract_strided_slice %71 {offsets = [0, 0], sizes = [8, 768], strides = [1, 1]} : vector<24x768xf32> to vector<8x768xf32>
    %78 = arith.mulf %77, %76 : vector<8x768xf32>
    %cst_16 = arith.constant dense<0.000000e+00> : vector<768xf32>
    %79 = vector.multi_reduction <add>, %78, %cst_16 [0] : vector<8x768xf32> to vector<768xf32>
    %80 = vector.shape_cast %79 : vector<768xf32> to vector<1x768xf32>
    %81 = vector.extract_strided_slice %71 {offsets = [8, 0], sizes = [8, 768], strides = [1, 1]} : vector<24x768xf32> to vector<8x768xf32>
    %82 = arith.mulf %81, %76 : vector<8x768xf32>
    %cst_17 = arith.constant dense<0.000000e+00> : vector<768xf32>
    %83 = vector.multi_reduction <add>, %82, %cst_17 [0] : vector<8x768xf32> to vector<768xf32>
    %84 = vector.shape_cast %83 : vector<768xf32> to vector<1x768xf32>
    %85 = vector.extract_strided_slice %71 {offsets = [16, 0], sizes = [8, 768], strides = [1, 1]} : vector<24x768xf32> to vector<8x768xf32>
    %86 = arith.mulf %85, %76 : vector<8x768xf32>
    %cst_18 = arith.constant dense<0.000000e+00> : vector<768xf32>
    %87 = vector.multi_reduction <add>, %86, %cst_18 [0] : vector<8x768xf32> to vector<768xf32>
    %88 = vector.shape_cast %87 : vector<768xf32> to vector<1x768xf32>
    %89 = arith.subf %21, %80 : vector<1x768xf32>
    %90 = arith.subf %23, %84 : vector<1x768xf32>
    %91 = arith.subf %25, %88 : vector<1x768xf32>
    %92 = arith.mulf %89, %89 : vector<1x768xf32>
    %93 = arith.mulf %90, %90 : vector<1x768xf32>
    %94 = arith.addf %92, %93 : vector<1x768xf32>
    %95 = arith.mulf %91, %91 : vector<1x768xf32>
    %96 = arith.addf %94, %95 : vector<1x768xf32>
    %97 = math.sqrt %96 : vector<1x768xf32>
    %cst_19 = arith.constant dense<0.000000e+00> : vector<1xf32>
    %98 = vector.multi_reduction <add>, %97, %cst_19 [1] : vector<1x768xf32> to vector<1xf32>
    %99 = vector.shape_cast %98 : vector<1xf32> to vector<1x1xf32>
    %c0_i32 = arith.constant 0 : i32
    %100 = arith.cmpi eq, %arg0, %c0_i32 : i32
    %101 = arith.extui %100 : i1 to i32
    %c0_i32_20 = arith.constant 0 : i32
    %102 = arith.cmpi ne, %101, %c0_i32_20 : i32
    scf.if %102 {
      %cst_27 = arith.constant 0.000000e+00 : f32
      %109 = vector.broadcast %cst_27 : f32 to vector<1x1xf32>
      %c0_28 = arith.constant 0 : index
      %c0_29 = arith.constant 0 : index
      %110 = vector.load %arg9[%c0_28, %c0_29] : memref<1x1xf32, #tpu.memory_space<vmem>>, vector<1x1xf32>
      tpu.vector_store %arg9[%c0_28, %c0_29], %109 {strides = array<i32>} : memref<1x1xf32, #tpu.memory_space<vmem>>, vector<1x1xf32>,
    } else {
    }
    %c0_21 = arith.constant 0 : index
    %c0_22 = arith.constant 0 : index
    %103 = vector.load %arg9[%c0_21, %c0_22] : memref<1x1xf32, #tpu.memory_space<vmem>>, vector<1x1xf32>
    %104 = arith.addf %103, %99 : vector<1x1xf32>
    %c0_23 = arith.constant 0 : index
    %c0_24 = arith.constant 0 : index
    %105 = vector.load %arg9[%c0_23, %c0_24] : memref<1x1xf32, #tpu.memory_space<vmem>>, vector<1x1xf32>
    tpu.vector_store %arg9[%c0_23, %c0_24], %104 {strides = array<i32>} : memref<1x1xf32, #tpu.memory_space<vmem>>, vector<1x1xf32>,
    %c0_i32_25 = arith.constant 0 : i32
    %106 = arith.cmpi eq, %arg0, %c0_i32_25 : i32
    %107 = arith.extui %106 : i1 to i32
    %c0_i32_26 = arith.constant 0 : i32
    %108 = arith.cmpi ne, %107, %c0_i32_26 : i32
    scf.if %108 {
      %c0_27 = arith.constant 0 : index
      %c0_28 = arith.constant 0 : index
      %109 = vector.load %arg9[%c0_27, %c0_28] : memref<1x1xf32, #tpu.memory_space<vmem>>, vector<1x1xf32>
      %cst_29 = arith.constant 7.812500e-03 : f32
      %110 = vector.broadcast %cst_29 : f32 to vector<1x1xf32>
      %111 = arith.mulf %109, %110 : vector<1x1xf32>
      %cst_30 = arith.constant 5.000000e-01 : f32
      %112 = vector.broadcast %cst_30 : f32 to vector<1x1xf32>
      %113 = arith.mulf %111, %112 : vector<1x1xf32>
      %c0_31 = arith.constant 0 : index
      %c0_32 = arith.constant 0 : index
      %114 = vector.load %arg5[%c0_31, %c0_32] : memref<6x4xf32, #tpu.memory_space<vmem>>, vector<6x4xf32>
      %115 = vector.extract_strided_slice %114 {offsets = [0, 0], sizes = [6, 3], strides = [1, 1]} : vector<6x4xf32> to vector<6x3xf32>
      %116 = arith.mulf %115, %115 : vector<6x3xf32>
      %cst_33 = arith.constant dense<0.000000e+00> : vector<6xf32>
      %117 = vector.multi_reduction <add>, %116, %cst_33 [1] : vector<6x3xf32> to vector<6xf32>
      %118 = vector.shape_cast %117 : vector<6xf32> to vector<6x1xf32>
      %119 = math.sqrt %118 : vector<6x1xf32>
      %cst_34 = arith.constant 9.99999996E-13 : f32
      %120 = vector.broadcast %cst_34 : f32 to vector<6x1xf32>
      %121 = arith.maximumf %119, %120 : vector<6x1xf32>
      %cst_35 = arith.constant 1.000000e+00 : f32
      %122 = vector.broadcast %cst_35 : f32 to vector<6x1xf32>
      %123 = arith.divf %122, %121 : vector<6x1xf32>
      %124 = vector.broadcast %123 : vector<6x1xf32> to vector<6x3xf32>
      %125 = arith.mulf %115, %124 : vector<6x3xf32>
      %c0_36 = arith.constant 0 : index
      %c0_37 = arith.constant 0 : index
      %126 = vector.load %arg6[%c0_36, %c0_37] : memref<4x6xf32, #tpu.memory_space<vmem>>, vector<4x6xf32>
      %127 = vector.extract_strided_slice %126 {offsets = [0, 0], sizes = [3, 6], strides = [1, 1]} : vector<4x6xf32> to vector<3x6xf32>
      %128 = arith.mulf %127, %127 : vector<3x6xf32>
      %cst_38 = arith.constant dense<0.000000e+00> : vector<6xf32>
      %129 = vector.multi_reduction <add>, %128, %cst_38 [0] : vector<3x6xf32> to vector<6xf32>
      %130 = vector.shape_cast %129 : vector<6xf32> to vector<1x6xf32>
      %131 = math.sqrt %130 : vector<1x6xf32>
      %cst_39 = arith.constant 9.99999996E-13 : f32
      %132 = vector.broadcast %cst_39 : f32 to vector<1x6xf32>
      %133 = arith.maximumf %131, %132 : vector<1x6xf32>
      %cst_40 = arith.constant 1.000000e+00 : f32
      %134 = vector.broadcast %cst_40 : f32 to vector<1x6xf32>
      %135 = arith.divf %134, %133 : vector<1x6xf32>
      %136 = vector.broadcast %135 : vector<1x6xf32> to vector<3x6xf32>
      %137 = arith.mulf %127, %136 : vector<3x6xf32>
      %138 = vector.extract_strided_slice %125 {offsets = [0, 0], sizes = [6, 1], strides = [1, 1]} : vector<6x3xf32> to vector<6x1xf32>
      %139 = vector.extract_strided_slice %137 {offsets = [0, 0], sizes = [1, 6], strides = [1, 1]} : vector<3x6xf32> to vector<1x6xf32>
      %140 = vector.broadcast %138 : vector<6x1xf32> to vector<6x6xf32>
      %141 = vector.broadcast %139 : vector<1x6xf32> to vector<6x6xf32>
      %142 = arith.mulf %140, %141 : vector<6x6xf32>
      %143 = vector.extract_strided_slice %125 {offsets = [0, 1], sizes = [6, 1], strides = [1, 1]} : vector<6x3xf32> to vector<6x1xf32>
      %144 = vector.extract_strided_slice %137 {offsets = [1, 0], sizes = [1, 6], strides = [1, 1]} : vector<3x6xf32> to vector<1x6xf32>
      %145 = vector.broadcast %143 : vector<6x1xf32> to vector<6x6xf32>
      %146 = vector.broadcast %144 : vector<1x6xf32> to vector<6x6xf32>
      %147 = arith.mulf %145, %146 : vector<6x6xf32>
      %148 = arith.addf %142, %147 : vector<6x6xf32>
      %149 = vector.extract_strided_slice %125 {offsets = [0, 2], sizes = [6, 1], strides = [1, 1]} : vector<6x3xf32> to vector<6x1xf32>
      %150 = vector.extract_strided_slice %137 {offsets = [2, 0], sizes = [1, 6], strides = [1, 1]} : vector<3x6xf32> to vector<1x6xf32>
      %151 = vector.broadcast %149 : vector<6x1xf32> to vector<6x6xf32>
      %152 = vector.broadcast %150 : vector<1x6xf32> to vector<6x6xf32>
      %153 = arith.mulf %151, %152 : vector<6x6xf32>
      %154 = arith.addf %148, %153 : vector<6x6xf32>
      %c0_41 = arith.constant 0 : index
      %c0_42 = arith.constant 0 : index
      %155 = vector.load %arg7[%c0_41, %c0_42] : memref<6x6xf32, #tpu.memory_space<vmem>>, vector<6x6xf32>
      %156 = arith.mulf %155, %154 : vector<6x6xf32>
      %157 = arith.mulf %156, %154 : vector<6x6xf32>
      %cst_43 = arith.constant dense<0.000000e+00> : vector<6xf32>
      %158 = vector.multi_reduction <add>, %157, %cst_43 [1] : vector<6x6xf32> to vector<6xf32>
      %159 = vector.shape_cast %158 : vector<6xf32> to vector<6x1xf32>
      %cst_44 = arith.constant dense<0.000000e+00> : vector<1xf32>
      %160 = vector.multi_reduction <add>, %159, %cst_44 [0] : vector<6x1xf32> to vector<1xf32>
      %161 = vector.shape_cast %160 : vector<1xf32> to vector<1x1xf32>
      %162 = arith.mulf %125, %125 : vector<6x3xf32>
      %cst_45 = arith.constant dense<0.000000e+00> : vector<6xf32>
      %163 = vector.multi_reduction <add>, %162, %cst_45 [1] : vector<6x3xf32> to vector<6xf32>
      %164 = vector.shape_cast %163 : vector<6xf32> to vector<6x1xf32>
      %cst_46 = arith.constant dense<0.000000e+00> : vector<1xf32>
      %165 = vector.multi_reduction <add>, %164, %cst_46 [0] : vector<6x1xf32> to vector<1xf32>
      %166 = vector.shape_cast %165 : vector<1xf32> to vector<1x1xf32>
      %cst_47 = arith.constant 2.000000e+00 : f32
      %167 = vector.broadcast %cst_47 : f32 to vector<1x1xf32>
      %168 = arith.mulf %167, %166 : vector<1x1xf32>
      %169 = arith.subf %161, %168 : vector<1x1xf32>
      %cst_48 = arith.constant 6.000000e+00 : f32
      %170 = vector.broadcast %cst_48 : f32 to vector<1x1xf32>
      %171 = arith.addf %169, %170 : vector<1x1xf32>
      %cst_49 = arith.constant 5.000000e-01 : f32
      %172 = vector.broadcast %cst_49 : f32 to vector<1x1xf32>
      %173 = arith.mulf %171, %172 : vector<1x1xf32>
      %cst_50 = arith.constant 2.500000e-01 : f32
      %174 = vector.broadcast %cst_50 : f32 to vector<1x1xf32>
      %175 = arith.mulf %174, %173 : vector<1x1xf32>
      %176 = arith.addf %113, %175 : vector<1x1xf32>
      %177 = tpu.iota {dimensions = array<i32: 1>} : vector<1x128xi32>
      %c0_i32_51 = arith.constant 0 : i32
      %178 = vector.broadcast %c0_i32_51 : i32 to vector<1x128xi32>
      %179 = arith.cmpi eq, %177, %178 : vector<1x128xi32>
      %cst_52 = arith.constant 0.000000e+00 : f32
      %180 = vector.shape_cast %176 : vector<1x1xf32> to vector<1x1xf32>
      %181 = vector.broadcast %180 : vector<1x1xf32> to vector<1x128xf32>
      %182 = vector.broadcast %cst_52 : f32 to vector<1x128xf32>
      %183 = arith.select %179, %181, %182 : vector<1x128xi1>, vector<1x128xf32>
      %c1_i32 = arith.constant 1 : i32
      %184 = vector.broadcast %c1_i32 : i32 to vector<1x128xi32>
      %185 = arith.cmpi eq, %177, %184 : vector<1x128xi32>
      %cst_53 = arith.constant 0.000000e+00 : f32
      %186 = vector.shape_cast %113 : vector<1x1xf32> to vector<1x1xf32>
      %187 = vector.broadcast %186 : vector<1x1xf32> to vector<1x128xf32>
      %188 = vector.broadcast %cst_53 : f32 to vector<1x128xf32>
      %189 = arith.select %185, %187, %188 : vector<1x128xi1>, vector<1x128xf32>
      %190 = arith.addf %183, %189 : vector<1x128xf32>
      %c2_i32 = arith.constant 2 : i32
      %191 = vector.broadcast %c2_i32 : i32 to vector<1x128xi32>
      %192 = arith.cmpi eq, %177, %191 : vector<1x128xi32>
      %cst_54 = arith.constant 0.000000e+00 : f32
      %193 = vector.shape_cast %173 : vector<1x1xf32> to vector<1x1xf32>
      %194 = vector.broadcast %193 : vector<1x1xf32> to vector<1x128xf32>
      %195 = vector.broadcast %cst_54 : f32 to vector<1x128xf32>
      %196 = arith.select %192, %194, %195 : vector<1x128xi1>, vector<1x128xf32>
      %197 = arith.addf %190, %196 : vector<1x128xf32>
      %c0_55 = arith.constant 0 : index
      %c0_56 = arith.constant 0 : index
      %198 = vector.load %arg8[%c0_55, %c0_56] : memref<1x128xf32, #tpu.memory_space<vmem>>, vector<1x128xf32>
      tpu.vector_store %arg8[%c0_55, %c0_56], %197 {strides = array<i32>} : memref<1x128xf32, #tpu.memory_space<vmem>>, vector<1x128xf32>,
    } else {
    }
    return
  }
  func.func @transform_0(%arg0: i32, %arg1: memref<2xf32, #tpu.memory_space<smem>>) -> (i32, i32) {
    %c0_i32 = arith.constant 0 : i32
    %c0_i32_0 = arith.constant 0 : i32
    %c0_i32_1 = arith.constant 0 : i32
    return %c0_i32, %c0_i32_0 : i32, i32
  }
  func.func @transform_1(%arg0: i32, %arg1: memref<2xf32, #tpu.memory_space<smem>>) -> (i32, i32) {
    %c0_i32 = arith.constant 0 : i32
    %c0_i32_0 = arith.constant 0 : i32
    return %c0_i32, %arg0 : i32, i32
  }
  func.func @transform_2(%arg0: i32, %arg1: memref<2xf32, #tpu.memory_space<smem>>) -> (i32, i32) {
    %c0_i32 = arith.constant 0 : i32
    %c0_i32_0 = arith.constant 0 : i32
    %c0_i32_1 = arith.constant 0 : i32
    return %c0_i32, %c0_i32_0 : i32, i32
  }
  func.func @transform_3(%arg0: i32, %arg1: memref<2xf32, #tpu.memory_space<smem>>) -> (i32, i32) {
    %c0_i32 = arith.constant 0 : i32
    %c0_i32_0 = arith.constant 0 : i32
    %c0_i32_1 = arith.constant 0 : i32
    return %c0_i32, %c0_i32_0 : i32, i32
  }
  func.func @transform_4(%arg0: i32, %arg1: memref<2xf32, #tpu.memory_space<smem>>) -> (i32, i32) {
    %c0_i32 = arith.constant 0 : i32
    %c0_i32_0 = arith.constant 0 : i32
    %c0_i32_1 = arith.constant 0 : i32
    return %c0_i32, %c0_i32_0 : i32, i32
  }
  func.func @transform_5(%arg0: i32, %arg1: memref<2xf32, #tpu.memory_space<smem>>) -> (i32, i32) {
    %c0_i32 = arith.constant 0 : i32
    %c0_i32_0 = arith.constant 0 : i32
    %c0_i32_1 = arith.constant 0 : i32
    return %c0_i32, %c0_i32_0 : i32, i32
  }
  func.func @transform_6(%arg0: i32, %arg1: memref<2xf32, #tpu.memory_space<smem>>) -> (i32, i32) {
    %c0_i32 = arith.constant 0 : i32
    %c0_i32_0 = arith.constant 0 : i32
    %c0_i32_1 = arith.constant 0 : i32
    return %c0_i32, %c0_i32_0 : i32, i32
  }
}

</mosaic_0001>

<bundles_post_ra>
// kernel: tpu_custom_call.1
= control target key start
LH: loop header
LB: loop body
LE: loop exit
PB: predicated region body
PF: predicated region fallthrough
CT: control target
= control target key end

     0   :  { %s2410_s0 = inlined_call_operand.vmem [shape: f32[2], index: 0, kind: input, shape index: {}]   ;;  %s2411_s1 = inlined_call_operand.hbm [shape: f32[4,768], index: 1, kind: input, shape index: {}]   ;;  %s2412_s2 = inlined_call_operand.vmem [shape: f32[3,128], index: 2, kind: input, shape index: {}]   ;;  %s2413_s3 = inlined_call_operand.hbm [shape: f32[24,64], index: 3, kind: input, shape index: {}]   ;;  %s2414_s4 = inlined_call_operand.vmem [shape: f32[6,4], index: 4, kind: input, shape index: {}]   ;;  %s2415_s5 = inlined_call_operand.vmem [shape: f32[4,6], index: 5, kind: input, shape index: {}]   ;;  %s2416_s6 = inlined_call_operand.vmem [shape: f32[6,6], index: 6, kind: input, shape index: {}]   ;;  %s2417_s7 = inlined_call_operand.hbm [shape: f32[1,128], index: 7, kind: output, shape index: {}]  }
   0x1   :  { %s12_s26 = sshll.u32 %s2410_s0, 4  ;;  %s13_s26 = int_to_ptr.vmem [resolvable:$true] %s12_s26 }
   0x2   :  { %s1639_s27 = scalar_lea.vmem %s13_s26, 16  ;;  %p1644_p1 = scmp.lt.s32.totalorder %s13_s26, %s13_s26 }
   0x3   :  { %p1640_p0 = scmp.ne.s32.totalorder %s13_s26, %s1639_s27  ;;  %p1645_p2 = scmp.lt.s32.totalorder %s1639_s27, %s1639_s27 }
   0x5   :  { %p1646_p3 = por %p1645_p2, %p1644_p1 }
   0x7   :  { %p1647_p4 = pnand %p1646_p3, %p1640_p0 }
   0x9   :  { %1650 = shalt.err (!%p1647_p4)  }
   0xa   :  { %s1725_s28 = smov [#allocation4]  }
   0xb   :  { %15 = dma.vmem_to_smem %s13_s26, 16, %s1725_s28, [#allocation3] }
   0xc   :  { %1717 = dma.done.wait [#allocation3], 16 }
   0xd   :  { %1718 = vsyncadd [#allocation3], 4294967280 }
   0xe   :  { %17 = sfence }
   0xf   :  { %18 = vsyncpa [#allocation6], 0 }
  0x10   :  { %19 = vsyncpa [#allocation9], 0 }
  0x11   :  { %20 = vsyncpa [#allocation7], 0  ;;  %s1726_s29 = smov [#allocation5]   ;;  %s1727_s8 = smov [#allocation8]  }
  0x12   :  { %s27_s30 = sshll.u32 %s1726_s29, 4  ;;  %s38_s0 = sshll.u32 %s1727_s8, 4  ;;  %s28_s30 = int_to_ptr.vmem [resolvable:$true] %s27_s30  ;;  %s1779_s0 = int_to_ptr.vmem [resolvable:$true] %s38_s0 }
  0x13   :  { %s1651_s11 = scalar_lea.hbm %s2411_s1, 384 }
  0x14   :  { %p1652_p5 = scmp.ne.s32.totalorder %s2411_s1, %s1651_s11  ;;  %p1655_p6 = scmp.lt.u32.totalorder %s1651_s11, %s2411_s1 }
  0x16   :  { %p1657_p7 = pnand %p1655_p6, %p1652_p5 }
  0x18   :  { %1660 = shalt.err (!%p1657_p7)
}
  0x19   :  { %s1661_s16 = scalar_lea.vmem %s28_s30, 384  ;;  %p1666_p9 = scmp.lt.s32.totalorder %s28_s30, %s28_s30 }
  0x1a   :  { %p1662_p8 = scmp.ne.s32.totalorder %s28_s30, %s1661_s16  ;;  %p1667_p10 = scmp.lt.s32.totalorder %s1661_s16, %s1661_s16 }
  0x1c   :  { %p1668_p11 = por %p1667_p10, %p1666_p9 }
  0x1e   :  { %p1669_p12 = pnand %p1668_p11, %p1662_p8 }
  0x20   :  { %1672 = shalt.err (!%p1669_p12)
}
  0x21   :  { %30 = dma.hbm_to_vmem [thread:$0]  %s2411_s1, 384, %s28_s30, [#allocation6]  }
  0x22   :  { %s1673_s21 = scalar_lea.hbm %s2413_s3, 384 }
  0x23   :  { %p1674_p13 = scmp.ne.s32.totalorder %s2413_s3, %s1673_s21  ;;  %p1677_p0 = scmp.lt.u32.totalorder %s1673_s21, %s2413_s3 }
  0x25   :  { %p1679_p1 = pnand %p1677_p0, %p1674_p13 }
  0x27   :  { %1682 = shalt.err (!%p1679_p1)
}
  0x28   :  { %s1683_s26 = scalar_lea.vmem %s1779_s0, 384  ;;  %p1688_p3 = scmp.lt.s32.totalorder %s1779_s0, %s1779_s0 }
  0x29   :  { %p1684_p2 = scmp.ne.s32.totalorder %s1779_s0, %s1683_s26  ;;  %p1689_p4 = scmp.lt.s32.totalorder %s1683_s26, %s1683_s26 }
  0x2b   :  { %p1690_p5 = por %p1689_p4, %p1688_p3 }
  0x2d   :  { %p1691_p6 = pnand %p1690_p5, %p1684_p2 }
  0x2f   :  { %1694 = shalt.err (!%p1691_p6)
}
  0x30   :  { %s1728_s1 = smov 128   ;;  %s1729_s27 = smov 8  }
  0x31   :  { %44 = dma.hbm_to_vmem [thread:$0]  %s2413_s3, 384, %s1779_s0, [#allocation9], %s1728_s1, %s1728_s1, %s1729_s27  }
  0x32   :  { %1719 = dma.done.wait [#allocation6], 384  }
  0x33   :  { %1720 = vsyncadd [#allocation6], 4294966912 }
  0x34   :  { %1721 = dma.done.wait [#allocation9], 384  }
  0x35   :  { %1722 = vsyncadd [#allocation9], 4294966912  ;;  %v2419_v0 = vmov 0.0   ;;  %v1815_v1 = vld [vmem:[%s2414_s4] sm:$0x3f]  ;;  %vm1169_vm0 = vcmask 21504   ;;  %v2418_v12 = vlaneseq }
  0x36   :  { %658 = vmatprep.mubr.f32.mxu0 %v2419_v0  ;;  %741 = vmatprep.mubr.f32.mxu1 %v2419_v0  ;;  %v1820_v2 = vld [vmem:[%s2412_s2] sm:$0x7]  ;;  %v1168_v4 = vmul.f32 %v1815_v1, %v1815_v1  ;;  %v1828_v6 = vld [vmem:[#allocation5 + $0x8] sm:$0xff]  ;;  %v1830_v7 = vld [vmem:[#allocation5 + $0x10] sm:$0xff]  ;;  %s57_s2 = sld [smem:[#allocation4]]  ;;  %s1312_s3 = sld [smem:[#allocation4 + $0x1]] }
  0x37   :  { %v1822_v3 = vld [vmem:[#allocation5] sm:$0xff]  ;;  %v64_v5 = vcombine.low %v1820_v2, %v1820_v2  ;;  %v1320_v22 = vrot.slane %v1828_v6, 11  ;;  %v1321_v24 = vrot.slane %v1830_v7, 11  ;;  %v1840_v26 = vshrl.u32 %v2418_v12, 7 }
  0x38   :  { %v1170_v8 = vsel %vm1169_vm0, %v1168_v4, 0.0  ;;  %v1319_v20 = vrot.slane %v1822_v3, 11  ;;  %v1322_v30 = vrot.slane %v1822_v3, 9  ;;  %v1323_v32 = vrot.slane %v1828_v6, 9 }
  0x39   :  { %v66_v9 = vmul.f32 %v64_v5, %v1822_v3  ;;  %v67_v10 = vmul.f32 %v64_v5, %v1828_v6  ;;  %v68_v11 = vmul.f32 %v64_v5, %v1830_v7  ;;  %1171 = vadd.xlane.f32.xlu0 %v1170_v8  ;;  %v1324_v34 = vrot.slane %v1830_v7, 9 }
  0x3a   :  { %v1848_v36 = vsub.s32 4, %v1840_v26  ;;  %v1853_v38 = vsub.s32 0, %v1840_v26 }
  0x3b   :  { %v1313_v13 = vrot.slane %v66_v9, 9  ;;  %v1316_v14 = vrot.slane %v66_v9, 10  ;;  %v1314_v15 = vrot.slane %v67_v10, 9  ;;  %v1317_v16 = vrot.slane %v67_v10, 10 }
  0x3c   :  { %v1315_v17 = vrot.slane %v68_v11, 9  ;;  %v1318_v18 = vrot.slane %v68_v11, 10  ;;  %v1863_v44 = vstv %s57_s2  ;;  %v1865_v45 = vstv %s1312_s3 }
  0x3d   :  { %v81_v19 = vadd.f32 %v1313_v13, %v66_v9  ;;  %v82_v21 = vadd.f32 %v1314_v15, %v67_v10 }
  0x3e   :  { %v83_v23 = vadd.f32 %v1315_v17, %v68_v11 }
  0x3f   :  { %v93_v25 = vadd.f32 %v1316_v14, %v81_v19  ;;  %v94_v27 = vadd.f32 %v1317_v16, %v82_v21 }
  0x40   :  { %v95_v28 = vadd.f32 %v1318_v18, %v83_v23 }
  0x41   :  { %v108_v29 = vadd.f32 %v1319_v20, %v93_v25  ;;  %v109_v31 = vadd.f32 %v1320_v22, %v94_v27 }
  0x42   :  { %v110_v33 = vadd.f32 %v1321_v24, %v95_v28 }
  0x43   :  { %v1845_v35 = vmul.f32 2.0, %v108_v29  ;;  %v1850_v37 = vmul.f32 2.0, %v109_v31 }
  0x44   :  { %v1855_v39 = vmul.f32 2.0, %v110_v33 }
  0x45   :  { %v114_v40 = vmul.f32 %v1845_v35, %v1822_v3  ;;  %v165_v41 = vmul.f32 %v1322_v30, %v1845_v35  ;;  %v115_v42 = vmul.f32 %v1850_v37, %v1828_v6  ;;  %v166_v43 = vmul.f32 %v1323_v32, %v1850_v37 }
  0x46   :  { %v1869_v46 = vmul.f32 %v1855_v39, %v1830_v7  ;;  %v1872_v47 = vmul.f32 %v1324_v34, %v1855_v39 }
  0x47   :  { %v127_v48 = vrot.slane %v114_v40, %v1848_v36  ;;  %v178_v49 = vrot.slane %v165_v41, %v1848_v36  ;;  %v135_v50 = vrot.slane %v115_v42, %v1848_v36  ;;  %v186_v51 = vrot.slane %v166_v43, %v1848_v36 }
  0x48   :  { %v123_v52 = vrot.slane %v114_v40, %v1853_v38  ;;  %v174_v53 = vrot.slane %v165_v41, %v1853_v38  ;;  %v131_v54 = vrot.slane %v115_v42, %v1853_v38  ;;  %v182_v55 = vrot.slane %v166_v43, %v1853_v38 }
  0x49   :  { %v1883_v56 = vsub.f32 %v1820_v2, %v127_v48  ;;  %v1886_v57 = vsub.f32 %v1820_v2, %v178_v49  ;;  %v1889_v58 = vsub.f32 %v1820_v2, %v135_v50  ;;  %v1892_v59 = vsub.f32 %v1820_v2, %v186_v51 }
  0x4a   :  { %v1895_v60 = vsub.f32 %v1820_v2, %v123_v52  ;;  %v1898_v61 = vsub.f32 %v1820_v2, %v174_v53  ;;  %v1901_v62 = vsub.f32 %v1820_v2, %v131_v54  ;;  %v1904_v63 = vsub.f32 %v1820_v2, %v182_v55 }
  0x4b   :  { %v260_v4 = vsub.f32 %v1883_v56, %v1863_v44  ;;  %v303_v5 = vsub.f32 %v1886_v57, %v1863_v44  ;;  %v262_v8 = vsub.f32 %v1889_v58, %v1863_v44  ;;  %v305_v9 = vsub.f32 %v1892_v59, %v1863_v44 }
  0x4c   :  { %v259_v10 = vsub.f32 %v1895_v60, %v1863_v44  ;;  %v302_v11 = vsub.f32 %v1898_v61, %v1863_v44  ;;  %v261_v13 = vsub.f32 %v1901_v62, %v1863_v44  ;;  %v304_v14 = vsub.f32 %v1904_v63, %v1863_v44 }
  0x4d   :  { %v267_v15 = vmul.f32 %v1865_v45, %v260_v4  ;;  %v309_v16 = vmul.f32 %v303_v5, %v1865_v45  ;;  %v269_v17 = vmul.f32 %v1865_v45, %v262_v8  ;;  %v311_v18 = vmul.f32 %v305_v9, %v1865_v45 }
  0x4e   :  { %v266_v19 = vmul.f32 %v1865_v45, %v259_v10  ;;  %v308_v20 = vmul.f32 %v302_v11, %v1865_v45  ;;  %v268_v21 = vmul.f32 %v1865_v45, %v261_v13  ;;  %v310_v22 = vmul.f32 %v304_v14, %v1865_v45 }
  0x4f   :  { %v273_v23 = vmul.f32 7.0, %v267_v15  ;;  %v315_v24 = vmul.f32 7.0, %v309_v16  ;;  %v275_v25 = vmul.f32 7.0, %v269_v17  ;;  %v317_v27 = vmul.f32 7.0, %v311_v18 }
  0x50   :  { %v272_v28 = vmul.f32 7.0, %v266_v19  ;;  %v314_v29 = vmul.f32 7.0, %v308_v20  ;;  %v274_v30 = vmul.f32 7.0, %v268_v21  ;;  %v316_v31 = vmul.f32 7.0, %v310_v22 }
  0x51   :  { %v1331_v32 = vmax.f32 %v273_v23, 0.0  ;;  %v1349_v33 = vmax.f32 %v315_v24, 0.0  ;;  %v1337_v34 = vmax.f32 %v275_v25, 0.0  ;;  %v1355_v40 = vmax.f32 %v317_v27, 0.0 }
  0x52   :  { %v1328_v41 = vmax.f32 %v272_v28, 0.0  ;;  %v1346_v42 = vmax.f32 %v314_v29, 0.0  ;;  %v1334_v43 = vmax.f32 %v274_v30, 0.0  ;;  %v1352_v48 = vmax.f32 %v316_v31, 0.0 }
  0x53   :  { %v1332_v49 = vmin.f32 %v1331_v32, 7.0  ;;  %v1350_v50 = vmin.f32 %v1349_v33, 7.0  ;;  %v1338_v51 = vmin.f32 %v1337_v34, 7.0  ;;  %v1356_v52 = vmin.f32 %v1355_v40, 7.0 }
  0x54   :  { %v1329_v53 = vmin.f32 %v1328_v41, 7.0  ;;  %v1347_v54 = vmin.f32 %v1346_v42, 7.0  ;;  %v1335_v55 = vmin.f32 %v1334_v43, 7.0  ;;  %v1353_v4 = vmin.f32 %v1352_v48, 7.0 }
  0x55   :  { %v1554_v5 = vcvt.f32.s32 %v1332_v49  ;;  %v1572_v8 = vcvt.f32.s32 %v1350_v50  ;;  %v1560_v9 = vcvt.f32.s32 %v1338_v51  ;;  %v1578_v10 = vcvt.f32.s32 %v1356_v52 }
  0x56   :  { %v1551_v11 = vcvt.f32.s32 %v1329_v53  ;;  %v1569_v13 = vcvt.f32.s32 %v1347_v54  ;;  %v1557_v14 = vcvt.f32.s32 %v1335_v55  ;;  %v1575_v15 = vcvt.f32.s32 %v1353_v4 }
  0x57   :  { %v387_v16 = vmul.u32 8, %v1554_v5  ;;  %v393_v17 = vrot.slane %v1572_v8, 1  ;;  %v389_v18 = vmul.u32 8, %v1560_v9  ;;  %v395_v19 = vrot.slane %v1578_v10, 1 }
  0x58   :  { %v386_v20 = vmul.u32 8, %v1551_v11  ;;  %v392_v21 = vrot.slane %v1569_v13, 1  ;;  %v388_v22 = vmul.u32 8, %v1557_v14  ;;  %v394_v23 = vrot.slane %v1575_v15, 1 }
  0x59   :  { %v399_v24 = vadd.s32 %v393_v17, %v387_v16  ;;  %v1931_v25 = vadd.s32 8, %v1840_v26  ;;  %v401_v27 = vadd.s32 %v395_v19, %v389_v18  ;;  %v1934_v28 = vadd.s32 16, %v1840_v26 }
  0x5a   :  { %v398_v29 = vadd.s32 %v392_v21, %v386_v20  ;;  %v400_v30 = vadd.s32 %v394_v23, %v388_v22  ;;  %v1937_v31 = vadd.s32 24, %v1840_v26  ;;  %v1940_v32 = vadd.s32 32, %v1840_v26 }
  0x5b   :  { %v1943_v33 = vrot.slane %v399_v24, %v1853_v38  ;;  %v1946_v34 = vrot.slane %v401_v27, %v1853_v38  ;;  %v143_v40 = vrot.slane %v1869_v46, %v1848_v36  ;;  %v194_v41 = vrot.slane %v1872_v47, %v1848_v36  ;;  %v2147_v27 = vld [vmem:[#allocation8] sm:$0xff] }
  0x5c   :  { %v1953_v42 = vrot.slane %v398_v29, %v1853_v38  ;;  %v1956_v43 = vrot.slane %v400_v30, %v1853_v38  ;;  %v139_v48 = vrot.slane %v1869_v46, %v1853_v38  ;;  %v190_v49 = vrot.slane %v1872_v47, %v1853_v38 }
  0x5d   :  { %vm438_vm1 = vcmp.eq.s32.totalorder %v1840_v26, %v1943_v33  ;;  %vm444_vm2 = vcmp.eq.s32.totalorder %v1931_v25, %v1943_v33  ;;  %vm440_vm3 = vcmp.eq.s32.totalorder %v1840_v26, %v1946_v34  ;;  %vm446_vm4 = vcmp.eq.s32.totalorder %v1931_v25, %v1946_v34 }
  0x5e   :  { %vm1493_vm5 = vmpackc.low %vm444_vm2, %vm438_vm1  ;;  %vm437_vm6 = vcmp.eq.s32.totalorder %v1840_v26, %v1953_v42  ;;  %vm443_vm7 = vcmp.eq.s32.totalorder %v1931_v25, %v1953_v42  ;;  %vm439_vm8 = vcmp.eq.s32.totalorder %v1840_v26, %v1956_v43  ;;  %vm445_vm9 = vcmp.eq.s32.totalorder %v1931_v25, %v1956_v43 }
  0x5f   :  { %v1731_v46 = vmov 1.0|1.0   ;;  %vm1509_vm10 = vmpackc.low %vm446_vm4, %vm440_vm3  ;;  %vm450_vm11 = vcmp.eq.s32.totalorder %v1934_v28, %v1943_v33  ;;  %vm456_vm12 = vcmp.eq.s32.totalorder %v1937_v31, %v1943_v33  ;;  %v1984_v47 = vadd.s32 40, %v1840_v26 }
  0x60   :  { %1494 = vmatprep.subr.msk.bf16.mxu0 %vm1493_vm5, %v1731_v46  ;;  %v1987_v50 = vadd.s32 48, %v1840_v26  ;;  %1510 = vmatprep.subr.msk.bf16.mxu1 %vm1509_vm10, %v1731_v46  ;;  %vm1495_vm13 = vmpackc.low %vm443_vm7, %vm437_vm6  ;;  %vm452_vm14 = vcmp.eq.s32.totalorder %v1934_v28, %v1946_v34  ;;  %vm458_vm15 = vcmp.eq.s32.totalorder %v1937_v31, %v1946_v34  ;;  %v1995_v51 = vsub.f32 %v1820_v2, %v143_v40 }
  0x61   :  { %v1998_v52 = vsub.f32 %v1820_v2, %v194_v41  ;;  %1496 = vmatpush1.bf16.msk.msra.mxu0 %vm1495_vm13, %v1731_v46  ;;  %vm1511_vm1 = vmpackc.low %vm445_vm9, %vm439_vm8  ;;  %vm449_vm2 = vcmp.eq.s32.totalorder %v1934_v28, %v1953_v42  ;;  %vm455_vm3 = vcmp.eq.s32.totalorder %v1937_v31, %v1953_v42  ;;  %v2012_v53 = vsub.f32 %v1820_v2, %v139_v48 }
  0x62   :  { %v2015_v54 = vsub.f32 %v1820_v2, %v190_v49  ;;  %1512 = vmatpush1.bf16.msk.msra.mxu1 %vm1511_vm1, %v1731_v46  ;;  %vm1497_vm4 = vmpackc.low %vm456_vm12, %vm450_vm11  ;;  %vm451_vm5 = vcmp.eq.s32.totalorder %v1934_v28, %v1956_v43  ;;  %vm457_vm6 = vcmp.eq.s32.totalorder %v1937_v31, %v1956_v43  ;;  %vm462_vm7 = vcmp.eq.s32.totalorder %v1940_v32, %v1943_v33 }
  0x63   :  { %v2031_v55 = vadd.s32 56, %v1840_v26  ;;  %1498 = vmatprep.subr.msk.bf16.mxu0 %vm1497_vm4, %v1731_v46  ;;  %vm1513_vm8 = vmpackc.low %vm458_vm15, %vm452_vm14  ;;  %vm468_vm9 = vcmp.eq.s32.totalorder %v1984_v47, %v1943_v33  ;;  %vm464_vm10 = vcmp.eq.s32.totalorder %v1940_v32, %v1946_v34  ;;  %vm470_vm11 = vcmp.eq.s32.totalorder %v1984_v47, %v1946_v34 }
  0x64   :  { %vm461_vm12 = vcmp.eq.s32.totalorder %v1940_v32, %v1953_v42  ;;  %1514 = vmatprep.subr.msk.bf16.mxu1 %vm1513_vm8, %v1731_v46  ;;  %vm1499_vm13 = vmpackc.low %vm455_vm3, %vm449_vm2  ;;  %vm467_vm14 = vcmp.eq.s32.totalorder %v1984_v47, %v1953_v42  ;;  %vm463_vm15 = vcmp.eq.s32.totalorder %v1940_v32, %v1956_v43  ;;  %vm469_vm1 = vcmp.eq.s32.totalorder %v1984_v47, %v1956_v43 }
  0x65   :  { %vm474_vm4 = vcmp.eq.s32.totalorder %v1987_v50, %v1943_v33  ;;  %1500 = vmatpush1.bf16.msk.msra.mxu0 %vm1499_vm13, %v1731_v46  ;;  %vm1515_vm2 = vmpackc.low %vm457_vm6, %vm451_vm5  ;;  %v264_v4 = vsub.f32 %v1995_v51, %v1863_v44  ;;  %v307_v5 = vsub.f32 %v1998_v52, %v1863_v44  ;;  %v263_v8 = vsub.f32 %v2012_v53, %v1863_v44 }
  0x66   :  { %v306_v9 = vsub.f32 %v2015_v54, %v1863_v44  ;;  %1516 = vmatpush1.bf16.msk.msra.mxu1 %vm1515_vm2, %v1731_v46  ;;  %vm1501_vm3 = vmpackc.low %vm468_vm9, %vm462_vm7  ;;  %vm480_vm5 = vcmp.eq.s32.totalorder %v2031_v55, %v1943_v33  ;;  %vm476_vm6 = vcmp.eq.s32.totalorder %v1987_v50, %v1946_v34  ;;  %vm482_vm9 = vcmp.eq.s32.totalorder %v2031_v55, %v1946_v34 }
  0x67   :  { %1502 = vmatprep.subr.msk.bf16.mxu0 %vm1501_vm3, %v1731_v46  ;;  %vm1517_vm8 = vmpackc.low %vm470_vm11, %vm464_vm10  ;;  %v271_v10 = vmul.f32 %v1865_v45, %v264_v4  ;;  %v313_v11 = vmul.f32 %v307_v5, %v1865_v45  ;;  %v270_v13 = vmul.f32 %v1865_v45, %v263_v8  ;;  %vm473_vm10 = vcmp.eq.s32.totalorder %v1987_v50, %v1953_v42  ;;  %v582_v8 = vld [vmem:[#allocation8 + $0x8] sm:$0xff] }
  0x68   :  { %v312_v14 = vmul.f32 %v306_v9, %v1865_v45  ;;  %1518 = vmatprep.subr.msk.bf16.mxu1 %vm1517_vm8, %v1731_v46  ;;  %vm1503_vm7 = vmpackc.low %vm467_vm14, %vm461_vm12  ;;  %vm479_vm11 = vcmp.eq.s32.totalorder %v2031_v55, %v1953_v42  ;;  %v1732_v15 = vmov 1   ;;  %v1733_v20 = vmov 0  }
  0x69   :  { %1615 = vset.pattern.permute.xlu1 %v1732_v15  ;;  %1504 = vmatpush1.bf16.msk.msra.mxu0 %vm1503_vm7, %v1731_v46  ;;  %vm1519_vm12 = vmpackc.low %vm469_vm1, %vm463_vm15  ;;  %v277_v16 = vmul.f32 7.0, %v271_v10  ;;  %v319_v17 = vmul.f32 7.0, %v313_v11  ;;  %v276_v18 = vmul.f32 7.0, %v270_v13  ;;  %vm475_vm14 = vcmp.eq.s32.totalorder %v1987_v50, %v1956_v43 }
  0x6a   :  { %v318_v19 = vmul.f32 7.0, %v312_v14  ;;  %1614 = vset.pattern.permute.xlu0 %v1733_v20  ;;  %1520 = vmatpush1.bf16.msk.msra.mxu1 %vm1519_vm12, %v1731_v46  ;;  %vm1505_vm13 = vmpackc.low %vm480_vm5, %vm474_vm4  ;;  %vm481_vm15 = vcmp.eq.s32.totalorder %v2031_v55, %v1956_v43  ;;  %vm584_vm2 = vcmask 523264   ;;  %v583_v14 = vld [vmem:[#allocation8 + $0x10] sm:$0xff] }
  0x6b   :  { %1506 = vmatprep.subr.msk.bf16.mxu0 %vm1505_vm13, %v1731_v46  ;;  %vm1521_vm1 = vmpackc.low %vm482_vm9, %vm476_vm6  ;;  %v1343_v21 = vmax.f32 %v277_v16, 0.0  ;;  %v1361_v22 = vmax.f32 %v319_v17, 0.0  ;;  %v1340_v23 = vmax.f32 %v276_v18, 0.0  ;;  %v1734_v16 = vmov 2   ;;  %v2208_v17 = vld [vmem:[%s2415_s5] sm:$0xf] }
  0x6c   :  { %v1358_v24 = vmax.f32 %v318_v19, 0.0  ;;  %1522 = vmatprep.subr.msk.bf16.mxu1 %vm1521_vm1, %v1731_v46  ;;  %vm1507_vm4 = vmpackc.low %vm479_vm11, %vm473_vm10  ;;  %v1185_v18 = vmul.f32 %v2208_v17, %v2208_v17 }
  0x6d   :  { %1508 = vmatpush1.bf16.msk.msra.mxu0 %vm1507_vm4, %v1731_v46  ;;  %vm1523_vm3 = vmpackc.low %vm481_vm15, %vm475_vm14  ;;  %v1344_v29 = vmin.f32 %v1343_v21, 7.0  ;;  %v1362_v30 = vmin.f32 %v1361_v22, 7.0  ;;  %v1341_v33 = vmin.f32 %v1340_v23, 7.0 }
  0x6e   :  { %v1359_v34 = vmin.f32 %v1358_v24, 7.0  ;;  %1524 = vmatpush1.bf16.msk.msra.mxu1 %vm1523_vm3, %v1731_v46 }
  0x6f   :  { %v1566_v40 = vcvt.f32.s32 %v1344_v29  ;;  %v1584_v41 = vcvt.f32.s32 %v1362_v30  ;;  %v1563_v43 = vcvt.f32.s32 %v1341_v33  ;;  %v1326_v29 = vrot.slane %v1828_v6, 10 }
  0x70   :  { %v1581_v48 = vcvt.f32.s32 %v1359_v34  ;;  %1446 = vmatmul.mubr.msk.f32.vlgmr.msra.gmra.mrb[0].mxu0 %vm584_vm2, %v2147_v27 }
  0x71   :  { %1465 = vmatmul.mubr.msk.f32.vlgmr.msra.gmra.mrb[0].mxu1 %vm584_vm2, %v2147_v27  ;;  %v391_v42 = vmul.u32 8, %v1566_v40  ;;  %v397_v49 = vrot.slane %v1584_v41, 1  ;;  %v390_v4 = vmul.u32 8, %v1563_v43  ;;  %664 = vmatprep.mubr.f32.mxu0 %v2419_v0  ;;  %v217_v34 = vmul.f32 %v1326_v29, %v1850_v37 }
  0x72   :  { %v396_v5 = vrot.slane %v1581_v48, 1  ;;  %747 = vmatprep.mubr.f32.mxu1 %v2419_v0  ;;  %v1327_v40 = vrot.slane %v1830_v7, 10 }
  0x73   :  { %v403_v9 = vadd.s32 %v397_v49, %v391_v42  ;;  %v233_v48 = vrot.slane %v217_v34, %v1853_v38  ;;  %v237_v49 = vrot.slane %v217_v34, %v1848_v36 }
  0x74   :  { %v402_v10 = vadd.s32 %v396_v5, %v390_v4  ;;  %1447 = vmatmul.mubr.msk.f32.gmra.mrb[2].mxu0 %vm584_vm2, %v582_v8 }
  0x75   :  { %v436_v11 = vrot.slane %v403_v9, %v1853_v38  ;;  %1466 = vmatmul.mubr.msk.f32.gmra.mrb[2].mxu1 %vm584_vm2, %v582_v8  ;;  %670 = vmatprep.mubr.f32.mxu0 %v2419_v0  ;;  %v2233_v37 = vsub.f32 %v1820_v2, %v237_v49 }
  0x76   :  { %v432_v13 = vrot.slane %v402_v10, %v1853_v38  ;;  %753 = vmatprep.mubr.f32.mxu1 %v2419_v0 }
  0x77   :  { %vm442_vm5 = vcmp.eq.s32.totalorder %v1840_v26, %v436_v11  ;;  %vm448_vm6 = vcmp.eq.s32.totalorder %v1931_v25, %v436_v11  ;;  %vm454_vm10 = vcmp.eq.s32.totalorder %v1934_v28, %v436_v11  ;;  %vm460_vm11 = vcmp.eq.s32.totalorder %v1937_v31, %v436_v11 }
  0x78   :  { %vm441_vm8 = vcmp.eq.s32.totalorder %v1840_v26, %v432_v13  ;;  %vm447_vm7 = vcmp.eq.s32.totalorder %v1931_v25, %v432_v13  ;;  %vm1525_vm9 = vmpackc.low %vm448_vm6, %vm442_vm5  ;;  %vm453_vm12 = vcmp.eq.s32.totalorder %v1934_v28, %v432_v13  ;;  %vm459_vm13 = vcmp.eq.s32.totalorder %v1937_v31, %v432_v13  ;;  %1448 = vmatmul.mubr.msk.f32.gmra.mrb[4].mxu0 %vm584_vm2, %v583_v14 }
  0x79   :  { %1526 = vmatprep.subr.msk.bf16.mxu0 %vm1525_vm9, %v1731_v46  ;;  %1541 = vmatprep.subr.msk.bf16.mxu1 %vm1525_vm9, %v1731_v46  ;;  %vm1527_vm14 = vmpackc.low %vm447_vm7, %vm441_vm8  ;;  %vm466_vm15 = vcmp.eq.s32.totalorder %v1940_v32, %v436_v11  ;;  %vm472_vm1 = vcmp.eq.s32.totalorder %v1984_v47, %v436_v11  ;;  %vm465_vm6 = vcmp.eq.s32.totalorder %v1940_v32, %v432_v13 }
  0x7a   :  { %1528 = vmatpush1.bf16.msk.msra.mxu0 %vm1527_vm14, %v1731_v46  ;;  %1545 = vmatpush1.bf16.msk.msra.mxu1 %vm1527_vm14, %v1731_v46  ;;  %vm1529_vm4 = vmpackc.low %vm460_vm11, %vm454_vm10  ;;  %vm471_vm8 = vcmp.eq.s32.totalorder %v1984_v47, %v432_v13  ;;  %vm478_vm7 = vcmp.eq.s32.totalorder %v1987_v50, %v436_v11  ;;  %vm484_vm9 = vcmp.eq.s32.totalorder %v2031_v55, %v436_v11 }
  0x7b   :  { %1530 = vmatprep.subr.msk.bf16.mxu0 %vm1529_vm4, %v1731_v46  ;;  %1542 = vmatprep.subr.msk.bf16.mxu1 %vm1529_vm4, %v1731_v46  ;;  %vm1531_vm3 = vmpackc.low %vm459_vm13, %vm453_vm12  ;;  %vm477_vm12 = vcmp.eq.s32.totalorder %v1987_v50, %v432_v13  ;;  %vm483_vm13 = vcmp.eq.s32.totalorder %v2031_v55, %v432_v13  ;;  %v347_v10 = vsub.f32 %v2233_v37, %v1863_v44 }
  0x7c   :  { %1467 = vmatmul.mubr.msk.f32.gmra.mrb[4].mxu1 %vm584_vm2, %v583_v14  ;;  %vm1533_vm5 = vmpackc.low %vm472_vm1, %vm466_vm15  ;;  %824 = vmatprep.mubr.f32.mxu0 %v2419_v0 }
  0x7d   :  { %830 = vmatprep.mubr.f32.mxu1 %v2419_v0  ;;  %vm1535_vm10 = vmpackc.low %vm471_vm8, %vm465_vm6 }
  0x7e   :  { %1532 = vmatpush1.bf16.msk.msra.mxu0 %vm1531_vm3, %v1731_v46  ;;  %1546 = vmatpush1.bf16.msk.msra.mxu1 %vm1531_vm3, %v1731_v46  ;;  %vm1537_vm11 = vmpackc.low %vm484_vm9, %vm478_vm7 }
  0x7f   :  { %1534 = vmatprep.subr.msk.bf16.mxu0 %vm1533_vm5, %v1731_v46  ;;  %1543 = vmatprep.subr.msk.bf16.mxu1 %vm1533_vm5, %v1731_v46  ;;  %vm1539_vm14 = vmpackc.low %vm483_vm13, %vm477_vm12  ;;  %vm1137_vm12 = vcmask 1040384  }
  0x82   :  { %1536 = vmatpush1.bf16.msk.msra.mxu0 %vm1535_vm10, %v1731_v46  ;;  %1547 = vmatpush1.bf16.msk.msra.mxu1 %vm1535_vm10, %v1731_v46  ;;  %vm1238_vm10 = vcmask 46080  }
  0x83   :  { %1538 = vmatprep.subr.msk.bf16.mxu0 %vm1537_vm11, %v1731_v46  ;;  %1544 = vmatprep.subr.msk.bf16.mxu1 %vm1537_vm11, %v1731_v46 }
  0x86   :  { %1540 = vmatpush1.bf16.msk.msra.mxu0 %vm1539_vm14, %v1731_v46  ;;  %1548 = vmatpush1.bf16.msk.msra.mxu1 %vm1539_vm14, %v1731_v46 }
  0x89   :  { %1484 = vmatmul.mubr.msk.f32.vlgmr.msra.gmra.mrb[6].mxu0 %vm584_vm2, %v2147_v27  ;;  %1485 = vmatmul.mubr.msk.f32.vlgmr.msra.gmra.mrb[6].mxu1 %vm584_vm2, %v582_v8 }
  0x8a   :  { %836 = vmatprep.mubr.f32.mxu1 %v2419_v0 }
  0x8d   :  { %1486 = vmatmul.mubr.msk.f32.gmra.mrb[8].mxu1 %vm584_vm2, %v583_v14  ;;  %vm1186_vm2 = vcmask 43008  }
  0x8e   :  { %v1187_v19 = vsel %vm1186_vm2, %v1185_v18, 0.0 }
  0x8f   :  { %v1188_v21 = vrot.slane %v1187_v19, 4 }
  0x91   :  { %v1189_v22 = vadd.f32 %v1188_v21, %v1187_v19 }
  0x93   :  { %v1190_v23 = vrot.slane %v1189_v22, 2 }
  0x95   :  { %v1191_v27 = vadd.f32 %v1190_v23, %v1189_v22 }
  0x97   :  { %v1192_v30 = vrot.slane %v1191_v27, 1 }
  0x99   :  { %v1193_v41 = vadd.f32 %v1192_v30, %v1191_v27 }
  0x9b   :  { %v1199_v19 = vand.u32 2147483648, %v1193_v41  ;;  %vm1198_vm4 = vcmp.eq.f32.partialorder %v1193_v41, 0.0 }
  0xc6   :  { %v1172_v25 = vpop.xlane.xlu0 %1171 }
  0xc7   :  { %1619 = vrsqrt.f32 %v1172_v25  ;;  %vm1175_vm15 = vcmp.eq.f32.partialorder %v1172_v25, inf  ;;  %v1178_v32 = vand.u32 2147483648, %v1172_v25  ;;  %vm1177_vm1 = vcmp.eq.f32.partialorder %v1172_v25, 0.0 }
  0xd1   :  { %v1620_v28 = vpop.eup %1619 }
  0xd2   :  { %v1174_v31 = vmul.f32 %v1620_v28, %v1172_v25 }
  0xd4   :  { %v1176_v47 = vsel %vm1175_vm15, %v1172_v25, %v1174_v31  ;;  %v353_v31 = vmul.f32 %v347_v10, %v1865_v45 }
  0xd5   :  { %v1179_v50 = vsel %vm1177_vm1, %v1178_v32, %v1176_v47 }
  0xd6   :  { %v1180_v55 = vmax.f32 %v1179_v50, 1e-12 }
  0xd8   :  { %1621 = vrcp.f32 %v1180_v55 }
  0xd9   :  { %1623 = vrsqrt.f32 %v1193_v41 }
  0xe2   :  { %v1622_v46 = vpop.eup %1621 }
  0xe3   :  { %v1183_v15 = vmul.f32 %v1622_v46, %v1815_v1  ;;  %v1624_v14 = vpop.eup %1623 }
  0xe4   :  { %v1195_v50 = vmul.f32 %v1624_v14, %v1193_v41 }
  0xe5   :  { %1216 = vperm.xlu1 %1615, %v1183_v15   ;;  %1207 = vperm.xlu0 %1614, %v1183_v15   ;;  %v1250_v1 = vmul.f32 %v1183_v15, %v1183_v15 }
  0xe7   :  { %v1251_v24 = vsel %vm1169_vm0, %v1250_v1, 0.0  ;;  %vm1196_vm0 = vcmp.eq.f32.partialorder %v1193_v41, inf }
  0xe8   :  { %v1197_v21 = vsel %vm1196_vm0, %v1193_v41, %v1195_v50 }
  0xe9   :  { %1616 = vset.pattern.permute.xlu1 %v1734_v16 }
  0xea   :  { %1226 = vperm.xlu1 %1616, %v1183_v15   ;;  %v359_v15 = vmul.f32 7.0, %v353_v31 }
  0xee   :  { %1617 = vset.pattern.permute.xlu1 %v1733_v20  ;;  %v1325_v20 = vrot.slane %v1822_v3, 10  ;;  %v218_v3 = vmul.f32 %v1327_v40, %v1855_v39 }
  0xf0   :  { %v216_v33 = vmul.f32 %v1325_v20, %v1845_v35  ;;  %v2227_v35 = vsub.f32 %v1820_v2, %v233_v48  ;;  %v241_v4 = vrot.slane %v218_v3, %v1853_v38  ;;  %v245_v5 = vrot.slane %v218_v3, %v1848_v36 }
  0xf2   :  { %v225_v43 = vrot.slane %v216_v33, %v1853_v38  ;;  %v229_v42 = vrot.slane %v216_v33, %v1848_v36  ;;  %v346_v8 = vsub.f32 %v2227_v35, %v1863_v44  ;;  %v2246_v11 = vsub.f32 %v1820_v2, %v241_v4 }
  0xf3   :  { %v2249_v13 = vsub.f32 %v1820_v2, %v245_v5 }
  0xf4   :  { %v2224_v6 = vsub.f32 %v1820_v2, %v225_v43  ;;  %v2230_v7 = vsub.f32 %v1820_v2, %v229_v42  ;;  %v352_v25 = vmul.f32 %v346_v8, %v1865_v45  ;;  %v348_v32 = vsub.f32 %v2246_v11, %v1863_v44 }
  0xf5   :  { %v349_v47 = vsub.f32 %v2249_v13, %v1863_v44 }
  0xf6   :  { %v344_v39 = vsub.f32 %v2224_v6, %v1863_v44  ;;  %v345_v9 = vsub.f32 %v2230_v7, %v1863_v44  ;;  %v358_v2 = vmul.f32 7.0, %v352_v25  ;;  %v354_v16 = vmul.f32 %v348_v32, %v1865_v45 }
  0xf7   :  { %v355_v18 = vmul.f32 %v349_v47, %v1865_v45  ;;  %v1200_v44 = vsel %vm1198_vm4, %v1199_v19, %v1197_v21 }
  0xf8   :  { %v350_v36 = vmul.f32 %v344_v39, %v1865_v45  ;;  %v351_v28 = vmul.f32 %v345_v9, %v1865_v45  ;;  %v1370_v1 = vmax.f32 %v358_v2, 0.0  ;;  %v360_v27 = vmul.f32 7.0, %v354_v16 }
  0xf9   :  { %v361_v20 = vmul.f32 7.0, %v355_v18  ;;  %v1201_v33 = vmax.f32 %v1200_v44, 1e-12  ;;  %v2262_v45 = vsub.s32 2, %v1840_v26 }
  0xfa   :  { %v356_v55 = vmul.f32 7.0, %v350_v36  ;;  %v357_v46 = vmul.f32 7.0, %v351_v28  ;;  %v1371_v30 = vmin.f32 %v1370_v1, 7.0  ;;  %v1376_v43 = vmax.f32 %v360_v27, 0.0 }
  0xfb   :  { %v1379_v48 = vmax.f32 %v361_v20, 0.0  ;;  %1625 = vrcp.f32 %v1201_v33 }
  0xfc   :  { %v1364_v22 = vmax.f32 %v356_v55, 0.0  ;;  %v1367_v23 = vmax.f32 %v357_v46, 0.0  ;;  %v1593_v49 = vcvt.f32.s32 %v1371_v30  ;;  %v1377_v4 = vmin.f32 %v1376_v43, 7.0 }
  0xfd   :  { %v1380_v5 = vmin.f32 %v1379_v48, 7.0 }
  0xfe   :  { %v1365_v29 = vmin.f32 %v1364_v22, 7.0  ;;  %v1368_v34 = vmin.f32 %v1367_v23, 7.0  ;;  %v854_v8 = vrot.slane %v1593_v49, %v2262_v45  ;;  %v1599_v14 = vcvt.f32.s32 %v1377_v4 }
  0xff   :  { %v1602_v36 = vcvt.f32.s32 %v1380_v5 }
 0x100   :  { %v1587_v42 = vcvt.f32.s32 %v1365_v29  ;;  %v1590_v41 = vcvt.f32.s32 %v1368_v34  ;;  %vm869_vm5 = vcmp.eq.s32.totalorder %v1840_v26, %v854_v8  ;;  %v862_v25 = vrot.slane %v1599_v14, %v2262_v45 }
 0x101   :  { %v866_v28 = vrot.slane %v1602_v36, %v2262_v45  ;;  %v2278_v47 = vsel %vm869_vm5, 1.0, %v2419_v0 }
 0x102   :  { %v846_v39 = vrot.slane %v1587_v42, %v2262_v45  ;;  %v850_v9 = vrot.slane %v1590_v41, %v2262_v45  ;;  %vm871_vm7 = vcmp.eq.s32.totalorder %v1840_v26, %v862_v25 }
 0x103   :  { %vm872_vm9 = vcmp.eq.s32.totalorder %v1840_v26, %v866_v28  ;;  %v2297_v27 = vsel %vm871_vm7, 1.0, %v2419_v0  ;;  %vm1155_vm7 = vcmask 0  }
 0x104   :  { %vm867_vm3 = vcmp.eq.s32.totalorder %v1840_v26, %v846_v39  ;;  %vm868_vm6 = vcmp.eq.s32.totalorder %v1840_v26, %v850_v9 }
 0x105   :  { %v1626_v31 = vpop.eup %1625  ;;  %v2275_v32 = vsel %vm867_vm3, 1.0, %v2419_v0  ;;  %v2281_v50 = vsel %vm868_vm6, 1.0, %v2419_v0 }
 0x106   :  { %v2289_v46 = vmul.f32 %v1626_v31, %v2208_v17  ;;  %v2300_v17 = vsel %vm872_vm9, 1.0, %v2419_v0  ;;  %vm1242_vm9 = vcmask 1045504  }
 0x10e   :  { %1252 = vadd.xlane.f32.xlu1 %v1251_v24  ;;  %v1373_v24 = vmax.f32 %v359_v15, 0.0  ;;  %v1221_v15 = vsub.s32 1, %v1840_v26 }
 0x110   :  { %v1374_v40 = vmin.f32 %v1373_v24, 7.0  ;;  %v2303_v29 = vrot.slane %v2289_v46, %v1221_v15 }
 0x112   :  { %v1596_v3 = vcvt.f32.s32 %v1374_v40 }
 0x114   :  { %v858_v10 = vrot.slane %v1596_v3, %v2262_v45 }
 0x116   :  { %vm870_vm8 = vcmp.eq.s32.totalorder %v1840_v26, %v858_v10 }
 0x117   :  { %v2284_v55 = vsel %vm870_vm8, 1.0, %v2419_v0 }
 0x143   :  { %v660_v2 = vpop.f32.mrb[0].mxu0 }
 0x144   :  { %v885_v16 = vmul.f32 %v2275_v32, %v660_v2  ;;  %v743_v18 = vpop.f32.mrb[0].mxu1  ;;  %v662_v19 = vpop.f32.mrb[1].mxu0 }
 0x145   :  { %v887_v21 = vmul.f32 %v2278_v47, %v743_v18  ;;  %v886_v22 = vmul.f32 %v2281_v50, %v662_v19  ;;  %v745_v1 = vpop.f32.mrb[1].mxu1 }
 0x146   :  { %v891_v23 = vrot.slane %v885_v16, 4  ;;  %v888_v24 = vmul.f32 %v2284_v55, %v745_v1 }
 0x147   :  { %v903_v20 = vrot.slane %v887_v21, 4  ;;  %v897_v26 = vrot.slane %v886_v22, 4  ;;  %v666_v44 = vpop.f32.mrb[2].mxu0 }
 0x148   :  { %v892_v33 = vadd.f32 %v891_v23, %v885_v16  ;;  %v909_v34 = vrot.slane %v888_v24, 4  ;;  %v927_v40 = vmul.f32 %v2275_v32, %v666_v44  ;;  %v749_v43 = vpop.f32.mrb[2].mxu1  ;;  %v668_v48 = vpop.f32.mrb[3].mxu0 }
 0x149   :  { %v904_v49 = vadd.f32 %v903_v20, %v887_v21  ;;  %v898_v41 = vadd.f32 %v897_v26, %v886_v22  ;;  %v929_v3 = vmul.f32 %v2278_v47, %v749_v43  ;;  %v928_v4 = vmul.f32 %v2281_v50, %v668_v48  ;;  %v751_v5 = vpop.f32.mrb[3].mxu1 }
 0x14a   :  { %v893_v39 = vrot.slane %v892_v33, 2  ;;  %v910_v8 = vadd.f32 %v909_v34, %v888_v24  ;;  %v933_v9 = vrot.slane %v927_v40, 4  ;;  %v930_v10 = vmul.f32 %v2284_v55, %v751_v5 }
 0x14b   :  { %v905_v14 = vrot.slane %v904_v49, 2  ;;  %v899_v36 = vrot.slane %v898_v41, 2  ;;  %v945_v25 = vrot.slane %v929_v3, 4  ;;  %v939_v28 = vrot.slane %v928_v4, 4  ;;  %v672_v31 = vpop.f32.mrb[4].mxu0 }
 0x14c   :  { %v894_v2 = vadd.f32 %v893_v39, %v892_v33  ;;  %v911_v15 = vrot.slane %v910_v8, 2  ;;  %v934_v16 = vadd.f32 %v933_v9, %v927_v40  ;;  %v951_v18 = vrot.slane %v930_v10, 4  ;;  %v674_v19 = vpop.f32.mrb[5].mxu0 }
 0x14d   :  { %v906_v21 = vadd.f32 %v905_v14, %v904_v49  ;;  %v900_v22 = vadd.f32 %v899_v36, %v898_v41  ;;  %v946_v1 = vadd.f32 %v945_v25, %v929_v3  ;;  %v940_v23 = vadd.f32 %v939_v28, %v928_v4 }
 0x14e   :  { %v895_v20 = vrot.slane %v894_v2, 1  ;;  %v912_v26 = vadd.f32 %v911_v15, %v910_v8  ;;  %v935_v24 = vrot.slane %v934_v16, 2  ;;  %v952_v44 = vadd.f32 %v951_v18, %v930_v10 }
 0x14f   :  { %v907_v34 = vrot.slane %v906_v21, 1  ;;  %v901_v43 = vrot.slane %v900_v22, 1  ;;  %v947_v48 = vrot.slane %v946_v1, 2  ;;  %v941_v5 = vrot.slane %v940_v23, 2  ;;  %v755_v12 = vpop.f32.mrb[4].mxu1 }
 0x150   :  { %v896_v0 = vadd.f32 %v895_v20, %v894_v2  ;;  %v913_v42 = vrot.slane %v912_v26, 1  ;;  %v936_v33 = vadd.f32 %v935_v24, %v934_v16  ;;  %v953_v39 = vrot.slane %v952_v44, 2  ;;  %v757_v40 = vpop.f32.mrb[5].mxu1 }
 0x151   :  { %v908_v9 = vadd.f32 %v907_v34, %v906_v21  ;;  %v902_v30 = vadd.f32 %v901_v43, %v900_v22  ;;  %v948_v49 = vadd.f32 %v947_v48, %v946_v1  ;;  %v942_v41 = vadd.f32 %v941_v5, %v940_v23 }
 0x152   :  { %v1011_v3 = vsub.f32 %v1895_v60, %v896_v0  ;;  %v914_v4 = vadd.f32 %v913_v42, %v912_v26  ;;  %v937_v8 = vrot.slane %v936_v33, 1  ;;  %v954_v14 = vadd.f32 %v953_v39, %v952_v44 }
 0x153   :  { %v1013_v10 = vsub.f32 %v1901_v62, %v908_v9  ;;  %v1012_v36 = vsub.f32 %v1883_v56, %v902_v30  ;;  %v949_v25 = vrot.slane %v948_v49, 1  ;;  %v943_v28 = vrot.slane %v942_v41, 1 }
 0x154   :  { %v1029_v2 = vmul.f32 %v1011_v3, %v1011_v3  ;;  %v1014_v15 = vsub.f32 %v1889_v58, %v914_v4  ;;  %v938_v16 = vadd.f32 %v937_v8, %v936_v33  ;;  %v955_v18 = vrot.slane %v954_v14, 1 }
 0x155   :  { %v1031_v21 = vmul.f32 %v1013_v10, %v1013_v10  ;;  %v1030_v22 = vmul.f32 %v1012_v36, %v1012_v36  ;;  %v950_v1 = vadd.f32 %v949_v25, %v948_v49  ;;  %v944_v23 = vadd.f32 %v943_v28, %v942_v41 }
 0x156   :  { %v1032_v20 = vmul.f32 %v1014_v15, %v1014_v15  ;;  %v1017_v0 = vsub.f32 %v1898_v61, %v938_v16  ;;  %v956_v60 = vadd.f32 %v955_v18, %v954_v14  ;;  %v969_v42 = vmul.f32 %v2275_v32, %v672_v31 }
 0x157   :  { %v1019_v62 = vsub.f32 %v1904_v63, %v950_v1  ;;  %v1018_v56 = vsub.f32 %v1886_v57, %v944_v23  ;;  %v971_v30 = vmul.f32 %v2278_v47, %v755_v12  ;;  %v970_v58 = vmul.f32 %v2281_v50, %v674_v19 }
 0x158   :  { %v1035_v26 = vmul.f32 %v1017_v0, %v1017_v0  ;;  %v1020_v24 = vsub.f32 %v1892_v59, %v956_v60  ;;  %v975_v44 = vrot.slane %v969_v42, 4  ;;  %v972_v34 = vmul.f32 %v2284_v55, %v757_v40 }
 0x159   :  { %v1037_v43 = vmul.f32 %v1019_v62, %v1019_v62  ;;  %v1036_v48 = vmul.f32 %v1018_v56, %v1018_v56  ;;  %v987_v61 = vrot.slane %v971_v30, 4  ;;  %v981_v5 = vrot.slane %v970_v58, 4 }
 0x15a   :  { %v1047_v33 = vrot.slane %v1035_v26, 1  ;;  %v1038_v32 = vmul.f32 %v1020_v24, %v1020_v24  ;;  %v976_v31 = vadd.f32 %v975_v44, %v969_v42  ;;  %v993_v63 = vrot.slane %v972_v34, 4 }
 0x15b   :  { %v1049_v39 = vrot.slane %v1037_v43, 1  ;;  %v1048_v57 = vrot.slane %v1036_v48, 1  ;;  %v988_v9 = vadd.f32 %v987_v61, %v971_v30  ;;  %v982_v12 = vadd.f32 %v981_v5, %v970_v58 }
 0x15c   :  { %v2325_v47 = vadd.f32 %v1047_v33, %v1029_v2  ;;  %v1050_v50 = vrot.slane %v1038_v32, 1  ;;  %v977_v19 = vrot.slane %v976_v31, 2  ;;  %v994_v59 = vadd.f32 %v993_v63, %v972_v34  ;;  %v826_v49 = vpop.f32.mrb[6].mxu0  ;;  %v832_v41 = vpop.f32.mrb[6].mxu1 }
 0x15d   :  { %v1061_v55 = vadd.f32 %v1049_v39, %v1031_v21  ;;  %v1060_v40 = vadd.f32 %v1048_v57, %v1030_v22  ;;  %v989_v3 = vrot.slane %v988_v9, 2  ;;  %v983_v4 = vrot.slane %v982_v12, 2  ;;  %v828_v8 = vpop.f32.mrb[7].mxu0  ;;  %v834_v14 = vpop.f32.mrb[7].mxu1 }
 0x15e   :  { %v1062_v10 = vadd.f32 %v1050_v50, %v1032_v20  ;;  %v978_v36 = vadd.f32 %v977_v19, %v976_v31  ;;  %v995_v25 = vrot.slane %v994_v59, 2  ;;  %v889_v28 = vmul.f32 %v2297_v27, %v826_v49 }
 0x15f   :  { %v990_v15 = vadd.f32 %v989_v3, %v988_v9  ;;  %v984_v16 = vadd.f32 %v983_v4, %v982_v12  ;;  %v931_v2 = vmul.f32 %v2297_v27, %v832_v41  ;;  %v890_v18 = vmul.f32 %v2300_v17, %v828_v8 }
 0x160   :  { %v979_v1 = vrot.slane %v978_v36, 1  ;;  %v996_v23 = vadd.f32 %v995_v25, %v994_v59  ;;  %v915_v0 = vrot.slane %v889_v28, 4  ;;  %v932_v21 = vmul.f32 %v2300_v17, %v834_v14  ;;  %v838_v22 = vpop.f32.mrb[8].mxu1 }
 0x161   :  { %v991_v60 = vrot.slane %v990_v15, 1  ;;  %v985_v42 = vrot.slane %v984_v16, 1  ;;  %v957_v62 = vrot.slane %v931_v2, 4  ;;  %v921_v20 = vrot.slane %v890_v18, 4  ;;  %v840_v56 = vpop.f32.mrb[9].mxu1 }
 0x162   :  { %v980_v30 = vadd.f32 %v979_v1, %v978_v36  ;;  %v997_v58 = vrot.slane %v996_v23, 1  ;;  %v916_v26 = vadd.f32 %v915_v0, %v889_v28  ;;  %v963_v24 = vrot.slane %v932_v21, 4 }
 0x163   :  { %v992_v44 = vadd.f32 %v991_v60, %v990_v15  ;;  %v986_v34 = vadd.f32 %v985_v42, %v984_v16  ;;  %v958_v43 = vadd.f32 %v957_v62, %v931_v2  ;;  %v922_v48 = vadd.f32 %v921_v20, %v890_v18 }
 0x164   :  { %v1023_v61 = vsub.f32 %v2224_v6, %v980_v30  ;;  %v998_v5 = vadd.f32 %v997_v58, %v996_v23  ;;  %v917_v33 = vrot.slane %v916_v26, 2  ;;  %v964_v32 = vadd.f32 %v963_v24, %v932_v21  ;;  %v1217_v59 = vpop.permute.xlu1 %1216  ;;  %v1208_v21 = vpop.permute.xlu0 %1207 }
 0x165   :  { %v1025_v31 = vsub.f32 %v2227_v35, %v992_v44  ;;  %v1024_v63 = vsub.f32 %v2230_v7, %v986_v34  ;;  %v959_v39 = vrot.slane %v958_v43, 2  ;;  %v923_v57 = vrot.slane %v922_v48, 2 }
 0x166   :  { %v1065_v9 = vmul.f32 %v1023_v61, %v1023_v61  ;;  %v1026_v12 = vsub.f32 %v2233_v37, %v998_v5  ;;  %v918_v50 = vadd.f32 %v917_v33, %v916_v26  ;;  %v965_v19 = vrot.slane %v964_v32, 2 }
 0x167   :  { %v1067_v49 = vmul.f32 %v1025_v31, %v1025_v31  ;;  %v1066_v41 = vmul.f32 %v1024_v63, %v1024_v63  ;;  %v960_v3 = vadd.f32 %v959_v39, %v958_v43  ;;  %v924_v4 = vadd.f32 %v923_v57, %v922_v48 }
 0x168   :  { %v1077_v6 = vrot.slane %v1065_v9, 2  ;;  %v1068_v8 = vmul.f32 %v1026_v12, %v1026_v12  ;;  %v919_v14 = vrot.slane %v918_v50, 1  ;;  %v966_v36 = vadd.f32 %v965_v19, %v964_v32 }
 0x169   :  { %v1079_v25 = vrot.slane %v1067_v49, 2  ;;  %v1078_v35 = vrot.slane %v1066_v41, 2  ;;  %v961_v28 = vrot.slane %v960_v3, 1  ;;  %v925_v7 = vrot.slane %v924_v4, 1  ;;  %v1227_v20 = vpop.permute.xlu1 %1226 }
 0x16a   :  { %v2336_v15 = vadd.f32 %v1077_v6, %v2325_v47  ;;  %v1080_v16 = vrot.slane %v1068_v8, 2  ;;  %v920_v37 = vadd.f32 %v919_v14, %v918_v50  ;;  %v967_v2 = vrot.slane %v966_v36, 1 }
 0x16b   :  { %v2338_v18 = vadd.f32 %v1079_v25, %v1061_v55  ;;  %v2340_v1 = vadd.f32 %v1078_v35, %v1060_v40  ;;  %v962_v23 = vadd.f32 %v961_v28, %v960_v3  ;;  %v926_v0 = vadd.f32 %v925_v7, %v924_v4 }
 0x16c   :  { %v2342_v60 = vadd.f32 %v1080_v16, %v1062_v10  ;;  %v968_v42 = vadd.f32 %v967_v2, %v966_v36  ;;  %v973_v62 = vmul.f32 %v2297_v27, %v838_v22  ;;  %v1015_v30 = vsub.f32 %v2012_v53, %v920_v37 }
 0x16d   :  { %v1021_v47 = vsub.f32 %v2015_v54, %v962_v23  ;;  %v974_v58 = vmul.f32 %v2300_v17, %v840_v56  ;;  %v1223_v55 = vmul.f32 %v2303_v29, %v1217_v59  ;;  %v1016_v40 = vsub.f32 %v1995_v51, %v926_v0 }
 0x16e   :  { %v1022_v26 = vsub.f32 %v1998_v52, %v968_v42  ;;  %v999_v24 = vrot.slane %v973_v62, 4  ;;  %v2420_v10 = vrot.slane %v2289_v46, %v1853_v38  ;;  %v2421_v53 = vrot.slane %v2289_v46, %v2262_v45  ;;  %v1235_v52 = vld [vmem:[%s2416_s6] sm:$0x3f]  ;;  %s1735_s6 = smov [#allocation10]  }
 0x16f   :  { %v1039_v34 = vmul.f32 %v1021_v47, %v1021_v47  ;;  %v1005_v27 = vrot.slane %v974_v58, 4  ;;  %1627 = vrsqrt.f32 %v2336_v15  ;;  %v1033_v29 = vmul.f32 %v1015_v30, %v1015_v30  ;;  %s1302_s12 = sshll.u32 %s1735_s6, 4  ;;  %s1303_s12 = int_to_ptr.vmem [resolvable:$true] %s1302_s12 }
 0x170   :  { %v1214_v44 = vmul.f32 %v2420_v10, %v1208_v21  ;;  %v1233_v22 = vmul.f32 %v2421_v53, %v1227_v20  ;;  %v1040_v54 = vmul.f32 %v1022_v26, %v1022_v26  ;;  %v1000_v43 = vadd.f32 %v999_v24, %v973_v62  ;;  %s1695_s13 = scalar_lea.vmem %s1303_s12, 16  ;;  %s1699_s14 = scalar_lea.vmem %s1303_s12, 32 }
 0x171   :  { %v1051_v51 = vrot.slane %v1039_v34, 1  ;;  %v1006_v56 = vadd.f32 %v1005_v27, %v974_v58  ;;  %v1034_v48 = vmul.f32 %v1016_v40, %v1016_v40  ;;  %1629 = vrsqrt.f32 %v2340_v1  ;;  %p1696_p7 = scmp.ne.s32.totalorder %s1303_s12, %s1695_s13  ;;  %p1700_p8 = scmp.lt.s32.totalorder %s1303_s12, %s1303_s12 }
 0x172   :  { %v1224_v17 = vadd.f32 %v1223_v55, %v1214_v44  ;;  %v1052_v61 = vrot.slane %v1040_v54, 1  ;;  %v1001_v5 = vrot.slane %v1000_v43, 2  ;;  %1631 = vrsqrt.f32 %v2338_v18  ;;  %p1701_p9 = scmp.lt.s32.totalorder %s1699_s14, %s1695_s13 }
 0x173   :  { %v1063_v32 = vadd.f32 %v1051_v51, %v1033_v29  ;;  %v1007_v31 = vrot.slane %v1006_v56, 2  ;;  %1633 = vrsqrt.f32 %v2342_v60  ;;  %vm1097_vm11 = vcmp.eq.f32.partialorder %v2336_v15, inf }
 0x174   :  { %v1234_v33 = vadd.f32 %v1233_v22, %v1224_v17  ;;  %v1064_v45 = vadd.f32 %v1052_v61, %v1034_v48  ;;  %v1002_v46 = vadd.f32 %v1001_v5, %v1000_v43  ;;  %v1100_v35 = vand.u32 2147483648, %v2336_v15  ;;  %p1702_p10 = por %p1701_p9, %p1700_p8 }
 0x175   :  { %v1008_v39 = vadd.f32 %v1007_v31, %v1006_v56  ;;  %vm1099_vm13 = vcmp.eq.f32.partialorder %v2336_v15, 0.0  ;;  %vm1104_vm14 = vcmp.eq.f32.partialorder %v2340_v1, inf  ;;  %vm1106_vm15 = vcmp.eq.f32.partialorder %v2340_v1, 0.0 }
 0x176   :  { %v1236_v63 = vmul.f32 %v1235_v52, %v1234_v33  ;;  %v1003_v57 = vrot.slane %v1002_v46, 1  ;;  %vm1111_vm1 = vcmp.eq.f32.partialorder %v2338_v18, inf  ;;  %v1114_v42 = vand.u32 2147483648, %v2338_v18  ;;  %p1703_p11 = pnand %p1702_p10, %p1696_p7 }
 0x177   :  { %v1009_v12 = vrot.slane %v1008_v39, 1  ;;  %vm1113_vm2 = vcmp.eq.f32.partialorder %v2338_v18, 0.0  ;;  %vm1118_vm0 = vcmp.eq.f32.partialorder %v2342_v60, inf  ;;  %v1121_v58 = vand.u32 2147483648, %v2342_v60 }
 0x178   :  { %v1237_v9 = vmul.f32 %v1236_v63, %v1234_v33  ;;  %v1004_v50 = vadd.f32 %v1003_v57, %v1002_v46  ;;  %vm1120_vm4 = vcmp.eq.f32.partialorder %v2342_v60, 0.0  ;;  %v2422_v5 = vmov 0.0  }
 0x179   :  { %v1010_v59 = vadd.f32 %v1009_v12, %v1008_v39  ;;  %v1628_v49 = vpop.eup %1627  ;;  %1156 = vst.msk [vmem:[#allocation2] sm:$0x1] %vm1155_vm7, %v2422_v5 }
 0x17a   :  { %v1239_v19 = vsel %vm1238_vm10, %v1237_v9, 0.0  ;;  %v1027_v41 = vsub.f32 %v2246_v11, %v1004_v50  ;;  %v1096_v4 = vmul.f32 %v1628_v49, %v2336_v15  ;;  %v1107_v11 = vand.u32 2147483648, %v2340_v1 }
 0x17b   :  { %1240 = vadd.xlane.f32.xlu1 %v1239_v19  ;;  %v1028_v3 = vsub.f32 %v2249_v13, %v1010_v59  ;;  %v1630_v8 = vpop.eup %1629 }
 0x17c   :  { %v1069_v6 = vmul.f32 %v1027_v41, %v1027_v41  ;;  %v1098_v36 = vsel %vm1097_vm11, %v2336_v15, %v1096_v4  ;;  %v1103_v28 = vmul.f32 %v1630_v8, %v2340_v1  ;;  %v1632_v7 = vpop.eup %1631 }
 0x17d   :  { %v1070_v14 = vmul.f32 %v1028_v3, %v1028_v3  ;;  %v1101_v37 = vsel %vm1099_vm13, %v1100_v35, %v1098_v36  ;;  %v1110_v23 = vmul.f32 %v1632_v7, %v2338_v18  ;;  %v1634_v0 = vpop.eup %1633 }
 0x17e   :  { %v1081_v25 = vrot.slane %v1069_v6, 2  ;;  %v1105_v2 = vsel %vm1104_vm14, %v2340_v1, %v1103_v28  ;;  %v1117_v20 = vmul.f32 %v1634_v0, %v2342_v60  ;;  %v1138_v30 = vsel %vm1137_vm12, %v1101_v37, 0.0 }
 0x17f   :  { %v1082_v16 = vrot.slane %v1070_v14, 2  ;;  %v1108_v62 = vsel %vm1106_vm15, %v1107_v11, %v1105_v2  ;;  %v1112_v15 = vsel %vm1111_vm1, %v2338_v18, %v1110_v23  ;;  %v2423_v2 = vlaneseq }
 0x180   :  { %v1093_v13 = vadd.f32 %v1081_v25, %v1063_v32  ;;  %v1115_v47 = vsel %vm1113_vm2, %v1114_v42, %v1112_v15  ;;  %v1119_v1 = vsel %vm1118_vm0, %v2342_v60, %v1117_v20  ;;  %v1139_v55 = vsel %vm1137_vm12, %v1108_v62, 0.0  ;;  %v1157_v4 = vld [vmem:[#allocation2] sm:$0x1] }
 0x181   :  { %v1094_v21 = vadd.f32 %v1082_v16, %v1064_v45  ;;  %v1122_v40 = vsel %vm1120_vm4, %v1121_v58, %v1119_v1  ;;  %v1140_v26 = vadd.f32 %v1139_v55, %v1138_v30  ;;  %v1141_v24 = vsel %vm1137_vm12, %v1115_v47, 0.0 }
 0x182   :  { %1635 = vrsqrt.f32 %v1093_v13  ;;  %v1143_v18 = vsel %vm1137_vm12, %v1122_v40, 0.0  ;;  %vm1125_vm3 = vcmp.eq.f32.partialorder %v1093_v13, inf  ;;  %v1128_v22 = vand.u32 2147483648, %v1093_v13 }
 0x183   :  { %1637 = vrsqrt.f32 %v1094_v21  ;;  %v1142_v10 = vadd.f32 %v1141_v24, %v1140_v26  ;;  %vm1127_vm5 = vcmp.eq.f32.partialorder %v1093_v13, 0.0  ;;  %vm1132_vm6 = vcmp.eq.f32.partialorder %v1094_v21, inf }
 0x184   :  { %v1135_v60 = vand.u32 2147483648, %v1094_v21  ;;  %vm1134_vm8 = vcmp.eq.f32.partialorder %v1094_v21, 0.0  ;;  %v1268_v23 = vand.u32 127, %v2423_v2 }
 0x185   :  { %v1144_v44 = vadd.f32 %v1143_v18, %v1142_v10 }
 0x186   :  { %vm1269_vm10 = vcmp.eq.s32.totalorder %v1268_v23, 0  ;;  %vm1280_vm11 = vcmp.eq.s32.totalorder %v1268_v23, 1 }
 0x18c   :  { %v1636_v34 = vpop.eup %1635 }
 0x18d   :  { %v1638_v27 = vpop.eup %1637  ;;  %v1124_v53 = vmul.f32 %v1636_v34, %v1093_v13 }
 0x18e   :  { %v1131_v54 = vmul.f32 %v1638_v27, %v1094_v21 }
 0x18f   :  { %v1126_v43 = vsel %vm1125_vm3, %v1093_v13, %v1124_v53 }
 0x190   :  { %v1129_v17 = vsel %vm1127_vm5, %v1128_v22, %v1126_v43  ;;  %v1133_v29 = vsel %vm1132_vm6, %v1094_v21, %v1131_v54 }
 0x191   :  { %v1136_v51 = vsel %vm1134_vm8, %v1135_v60, %v1133_v29  ;;  %v1145_v56 = vsel %vm1137_vm12, %v1129_v17, 0.0 }
 0x192   :  { %v1146_v52 = vadd.f32 %v1145_v56, %v1144_v44  ;;  %v1147_v48 = vsel %vm1137_vm12, %v1136_v51, 0.0  ;;  %vm1292_vm12 = vcmp.eq.s32.totalorder %v1268_v23, 2 }
 0x194   :  { %v1148_v61 = vadd.f32 %v1147_v48, %v1146_v52 }
 0x196   :  { %1149 = vadd.xlane.f32.xlu0 %v1148_v61 }
 0x19b   :  { %v1253_v33 = vpop.xlane.xlu1 %1252 }
 0x19c   :  { %v1254_v31 = vsel %vm1242_vm9, %v1253_v33, 0.0 }
 0x19d   :  { %v1255_v46 = vrot.slane %v1254_v31, 4 }
 0x19f   :  { %v1256_v39 = vadd.f32 %v1255_v46, %v1254_v31 }
 0x1a1   :  { %v1257_v9 = vrot.slane %v1256_v39, 2 }
 0x1a3   :  { %v1258_v50 = vadd.f32 %v1257_v9, %v1256_v39 }
 0x1a5   :  { %v1259_v59 = vrot.slane %v1258_v50, 1 }
 0x1a7   :  { %v1260_v41 = vadd.f32 %v1259_v59, %v1258_v50 }
 0x1a9   :  { %v1261_v6 = vmul.f32 2.0, %v1260_v41 }
 0x208   :  { %v1241_v32 = vpop.xlane.xlu1 %1240 }
 0x209   :  { %v1243_v45 = vsel %vm1242_vm9, %v1241_v32, 0.0 }
 0x20a   :  { %v1244_v63 = vrot.slane %v1243_v45, 4 }
 0x20c   :  { %v1245_v57 = vadd.f32 %v1244_v63, %v1243_v45 }
 0x20e   :  { %v1246_v12 = vrot.slane %v1245_v57, 2 }
 0x210   :  { %v1247_v19 = vadd.f32 %v1246_v12, %v1245_v57 }
 0x212   :  { %v1248_v49 = vrot.slane %v1247_v19, 1 }
 0x214   :  { %v1249_v3 = vadd.f32 %v1248_v49, %v1247_v19 }
 0x216   :  { %v1262_v14 = vsub.f32 %v1249_v3, %v1261_v6 }
 0x218   :  { %v1263_v25 = vadd.f32 6.0, %v1262_v14 }
 0x21a   :  { %v1264_v35 = vmul.f32 0.5, %v1263_v25 }
 0x21c   :  { %v1265_v11 = vmul.f32 0.25, %v1264_v35  ;;  %v1293_v30 = vsel %vm1292_vm12, %v1264_v35, 0.0 }
 0x223   :  { %v1150_v8 = vpop.xlane.xlu0 %1149 }
 0x224   :  { %v1158_v36 = vadd.f32 %v1157_v4, %v1150_v8 }
 0x226   :  { %1160 = vst.msk [vmem:[#allocation2] sm:$0x1] %vm1155_vm7, %v1158_v36 }
 0x22d   :  { %v1164_v28 = vld [vmem:[#allocation2] sm:$0x1] }
 0x22e   :  { %v1165_v7 = vmul.f32 0.0078125, %v1164_v28 }
 0x230   :  { %v1166_v16 = vmul.f32 0.5, %v1165_v7 }
 0x232   :  { %v1266_v13 = vadd.f32 %v1265_v11, %v1166_v16 }
 0x234   :  { %1272 = vperm.xlu1 %1617, %v1266_v13  }
 0x238   :  { %1283 = vperm.xlu1 %1617, %v1166_v16  }
 0x2b3   :  { %v1273_v37 = vpop.permute.xlu1 %1272 }
 0x2b4   :  { %v1278_v0 = vrot.slane %v1273_v37, %v1853_v38 }
 0x2b6   :  { %v1279_v62 = vsel %vm1269_vm10, %v1278_v0, 0.0 }
 0x2b7   :  { %v1284_v21 = vpop.permute.xlu1 %1283 }
 0x2b8   :  { %v1289_v42 = vrot.slane %v1284_v21, %v1853_v38 }
 0x2ba   :  { %v1290_v15 = vsel %vm1280_vm11, %v1289_v42, 0.0 }
 0x2bb   :  { %v1291_v20 = vadd.f32 %v1290_v15, %v1279_v62 }
 0x2bd   :  { %v1294_v47 = vadd.f32 %v1293_v30, %v1291_v20 }
 0x2bf   :  { %1295 = vst [vmem:[#allocation10] sm:$0x1] %v1294_v47 }
 0x2c0   :  { %1706 = shalt.err (!%p1703_p11)
}
 0x2c1   :  { %s1707_s17 = scalar_lea.hbm %s2417_s7, 16 }
 0x2c2   :  { %p1708_p12 = scmp.ne.s32.totalorder %s2417_s7, %s1707_s17  ;;  %p1711_p13 = scmp.lt.u32.totalorder %s1707_s17, %s2417_s7 }
 0x2c4   :  { %p1713_p0 = pnand %p1711_p13, %p1708_p12 }
 0x2c6   :  { %1716 = shalt.err (!%p1713_p0)
}
 0x2c7   :  { %1305 = dma.vmem_to_hbm [thread:$0]  %s1303_s12, 16, %s2417_s7, [#allocation7]  }
 0x2c8   :  { %1723 = dma.done.wait [#allocation7], 16  }
 0x2c9   :  { %1724 = vsyncadd [#allocation7], 4294967280 }
 0x2ca   :  { %1309 = vsyncpa [#allocation6], 1 }
 0x2cb   :  { %1310 = vsyncpa [#allocation9], 1 }
 0x2cc   :  { %1311 = vsyncpa [#allocation7], 1 }

</bundles_post_ra>
